<compile_context>
chip_gen: v6e
topology: v6e:2x2x1
jax: 0.10.0
libtpu: 0.0.40
codegen_flags: <defaults>
</compile_context>

<pallas_src>
import functools

import jax
import jax.numpy as jnp
from jax.experimental import pallas as pl
from jax.experimental.pallas import tpu as pltpu


# ----------------------------- Pallas kernel -------------------------------
def _fused_pas_kernel(num_iter,
                      wpre_ref,            # (C,)          f32  SMEM scalar-prefetch gate
                      xi_ref,              # (1, ts, H)    bf16 init-model encoded tile
                      wpi_ref,             # (H, C*Hc)     bf16 init predicate proj weights
                      hai_ref,             # (1, S, C*Hc)  bf16 init arg features (tanh'd, hoisted)
                      xc_ref,              # (1, ts, H)    bf16 cond-model encoded tile
                      wpc_ref,             # (H, C*Hc)     bf16 cond predicate proj weights
                      hac_ref,             # (1, S, C*Hc)  bf16 cond arg features (tanh'd, hoisted)
                      bias_ref,            # (1, C, ts, S) bf16 additive NG-token mask bias (0 / -1024)
                      tgt_ref,             # (1, C, ts, S) bf16 gold target (0 / 1)
                      *outs):              # num_iter+1 x (1,C,ts,S) bf16 logits; then (1,1,n_out,1) f32 nll
    n_out = num_iter + 1
    out_refs = outs[:n_out]
    nll_ref = outs[n_out]

    C = bias_ref.shape[1]
    CHc = hai_ref.shape[2]
    Hc = CHc // C

    # Predicate-side projections for this tile: wide bf16 MXU matmul, f32 acc, tanh.
    hp_i = jnp.tanh(jnp.dot(xi_ref[0], wpi_ref[...],
                            preferred_element_type=jnp.float32)).astype(jnp.bfloat16)  # (ts, C*Hc)
    hp_c = jnp.tanh(jnp.dot(xc_ref[0], wpc_ref[...],
                            preferred_element_type=jnp.float32)).astype(jnp.bfloat16)  # (ts, C*Hc)

    ha_i = hai_ref[0]                                   # (S, C*Hc) bf16 (already tanh'd)
    ha_c = hac_ref[0]

    nll_acc = [jnp.float32(0.0)] * n_out

    for c in range(C):                                  # static unroll, C is small
        lo, hi = c * Hc, (c + 1) * Hc
        bias_c = bias_ref[0, c].astype(jnp.float32)     # (ts, S) lane-dense
        tgt_c = tgt_ref[0, c].astype(jnp.float32)

        def score_stats(s, need_sm):
            # cross-entropy contribution and (optionally) softmax(s) for conditioning,
            # sharing one max/exp/sum pass.
            m = jnp.max(s, axis=-1, keepdims=True)
            z = s - m
            pe = jnp.exp(z)
            spe = jnp.sum(pe, axis=-1, keepdims=True)
            nll = jnp.sum(-(z - jnp.log(spe)) * tgt_c)
            sm = pe * pl.reciprocal(spe, approx=True) if need_sm else None
            return nll, sm

        # --- iteration 0: initial (Baseline) model ---
        s0 = jax.lax.dot_general(hp_i[:, lo:hi], ha_i[:, lo:hi],
                                 (((1,), (1,)), ((), ())),
                                 preferred_element_type=jnp.float32) + bias_c   # (ts, S)
        out_refs[0][0, c] = s0.astype(jnp.bfloat16)
        nll0, pre_sm = score_stats(s0, need_sm=(n_out > 1))
        nll_acc[0] = nll_acc[0] + nll0

        # --- conditional model base score (constant across refinement iterations) ---
        if n_out > 1:
            sbase = jax.lax.dot_general(hp_c[:, lo:hi], ha_c[:, lo:hi],
                                        (((1,), (1,)), ((), ())),
                                        preferred_element_type=jnp.float32) + bias_c

        # --- refinement iterations: condition on softmax(previous logits) ---
        for it in range(1, n_out):
            s = sbase + wpre_ref[c] * pre_sm
            out_refs[it][0, c] = s.astype(jnp.bfloat16)
            nll_it, pre_sm = score_stats(s, need_sm=(it < n_out - 1))
            nll_acc[it] = nll_acc[it] + nll_it

    nll_ref[...] = jnp.stack(nll_acc).astype(jnp.float32).reshape(1, 1, n_out, 1)


# --------------------------- pallas_call wrapper -----------------------------
def _run_fused(x_i, w_prd_i, ha_i, x_c, w_prd_c, ha_c, wpre,
               mask_bias, target_b, num_iter, ts=None):
    """One fused pass over all iterations.

    Returns ([logits_0 .. logits_num_iter] in (B,C,S,S) bf16, nll (B,n_t,n_out,1) f32).
    """
    B, C, S, _ = mask_bias.shape
    H = x_i.shape[-1]
    CHc = w_prd_i.shape[1]
    n_out = num_iter + 1

    if ts is None:
        ts = S
        for cand in (256, 128, 64, 32, 16, 8):   # largest lane/sublane-friendly divisor
            if S % cand == 0:
                ts = min(S, cand)
                break
    assert S % ts == 0
    n_t = S // ts

    # VMEM budget: double-buffered blocks + margin, clamped to be safe on v7x (64 MiB
    # physical) while lifting the v5e ~16 MiB default scoped limit.
    bpe = 2  # bf16
    blk = (2 * ts * H * bpe + 2 * H * CHc * bpe + 2 * S * CHc * bpe
           + (2 + n_out) * C * ts * S * bpe + n_out * 4)
    vmem_limit = int(min(max(2 * blk + (8 << 20), 32 << 20), 56 << 20))

    grid_spec = pltpu.PrefetchScalarGridSpec(
        num_scalar_prefetch=1,                  # wpre gate -> SMEM, visible to index_maps too
        grid=(B, n_t),
        in_specs=[
            pl.BlockSpec((1, ts, H), lambda b, t, wp: (b, t, 0)),        # x_init tile
            pl.BlockSpec((H, CHc), lambda b, t, wp: (0, 0)),             # w_prd_init
            pl.BlockSpec((1, S, CHc), lambda b, t, wp: (b, 0, 0)),       # ha_init (full sequence)
            pl.BlockSpec((1, ts, H), lambda b, t, wp: (b, t, 0)),        # x_cond tile
            pl.BlockSpec((H, CHc), lambda b, t, wp: (0, 0)),             # w_prd_cond
            pl.BlockSpec((1, S, CHc), lambda b, t, wp: (b, 0, 0)),       # ha_cond (full sequence)
            pl.BlockSpec((1, C, ts, S), lambda b, t, wp: (b, 0, t, 0)),  # mask bias
            pl.BlockSpec((1, C, ts, S), lambda b, t, wp: (b, 0, t, 0)),  # target
        ],
        out_specs=tuple(
            [pl.BlockSpec((1, C, ts, S), lambda b, t, wp: (b, 0, t, 0))
             for _ in range(n_out)]
            + [pl.BlockSpec((1, 1, n_out, 1), lambda b, t, wp: (b, t, 0, 0))]),
    )

    out_shapes = tuple(
        [jax.ShapeDtypeStruct((B, C, S, S), jnp.bfloat16) for _ in range(n_out)]
        + [jax.ShapeDtypeStruct((B, n_t, n_out, 1), jnp.float32)])

    results = pl.pallas_call(
        functools.partial(_fused_pas_kernel, num_iter),
        grid_spec=grid_spec,
        out_shape=out_shapes,
        compiler_params=pltpu.CompilerParams(
            dimension_semantics=("parallel", "parallel"),   # v7x: B*n_t >= 2 keeps both TCs busy
            vmem_limit_bytes=vmem_limit),
    )(wpre, x_i, w_prd_i, ha_i, x_c, w_prd_c, ha_c, mask_bias, target_b)

    return list(results[:n_out]), results[n_out]


# ------------------------------ forward pass --------------------------------
def forward(params, input_ids, attention_mask, segment_ids, ng_token_mask,
            target, num_iter=2, ts=None):
    """Mirrors IterativeRefinementModel.forward.

    Returns (loss, initial_output, refined_output_1, ..., refined_output_num_iter),
    each output in the original (B, S_pred, C, S_arg) layout (bf16).
    """
    B, S = input_ids.shape
    C = ng_token_mask.shape[2]

    # get_mask(attention_mask, ng_token_mask) -> valid argument candidates; relayout once
    # to case-major (B, C, S_pred, S_arg) and fold into an additive bias (constant over iters).
    mask = attention_mask[:, None, None, :].astype(bool) & ng_token_mask        # (B,S,C,S)
    mask_bias = jnp.transpose(~mask, (0, 2, 1, 3)).astype(jnp.bfloat16) * (-1024.0)
    target_b = jnp.transpose(target, (0, 2, 1, 3)).astype(jnp.bfloat16)          # (B,C,S,S)
    tsum = jnp.sum(target.astype(jnp.float32))

    def encode(p):
        # TODO(synk): BERT encoder + dropout replaced by token + segment embedding.
        return (p["tok_emb"][input_ids] + p["seg_emb"][segment_ids]).astype(jnp.bfloat16)

    def arg_features(p, x):
        # Hoisted argument-side projection: ONE wide matmul per model per batch
        # (was recomputed for every predicate tile inside the kernel before).
        w_arg = p["w_arg"].astype(jnp.bfloat16)
        return jnp.tanh(jnp.einsum("bsh,hk->bsk", x, w_arg,
                                   preferred_element_type=jnp.float32)).astype(jnp.bfloat16)

    x_i = encode(params["init"])
    x_c = encode(params["cond"])
    ha_i = arg_features(params["init"], x_i)
    ha_c = arg_features(params["cond"], x_c)
    w_prd_i = params["init"]["w_prd"].astype(jnp.bfloat16)
    w_prd_c = params["cond"]["w_prd"].astype(jnp.bfloat16)
    wpre = params["cond"]["w_pre"].astype(jnp.float32).reshape(C)

    outputs_cm, nll = _run_fused(x_i, w_prd_i, ha_i, x_c, w_prd_c, ha_c, wpre,
                                 mask_bias, target_b, num_iter, ts=ts)

    # cross_entropy_pas_loss per iteration: sum(-log_softmax * target) / (sum(target)+eps)
    nll_per_iter = jnp.sum(nll, axis=(0, 1, 3))           # (num_iter+1,)
    losses = nll_per_iter / (tsum + 1e-6)
    loss = jnp.mean(losses)

    # Return in the original (B, S_pred, C, S_arg) layout; outputs are bf16 so this
    # relayout costs half the HBM traffic of the previous f32 version.
    outputs = [jnp.transpose(o, (0, 2, 1, 3)) for o in outputs_cm]
    return (loss, *outputs)


# --------------------------------- demo --------------------------------------
if __name__ == "__main__":
    # Hc = 128 keeps per-case lane slices 128-aligned (pad to 256 on v6e/v7x deployments).
    B, S, C, H, Hc = 2, 16, 4, 32, 128
    VOCAB, NSEG = 100, 4
    NUM_ITER = 2

    key = jax.random.PRNGKey(0)
    keys = jax.random.split(key, 8)

    def make_model(k, with_pre):
        ks = jax.random.split(k, 5)
        p = {
            "tok_emb": 0.02 * jax.random.normal(ks[0], (VOCAB, H), jnp.float32),
            "seg_emb": 0.02 * jax.random.normal(ks[1], (NSEG, H), jnp.float32),
            "w_prd": jax.random.normal(ks[2], (H, C * Hc), jnp.float32) / jnp.sqrt(H),
            "w_arg": jax.random.normal(ks[3], (H, C * Hc), jnp.float32) / jnp.sqrt(H),
        }
        if with_pre:
            p["w_pre"] = jax.random.normal(ks[4], (C,), jnp.float32)
        return p

    params = {"init": make_model(keys[0], False),
              "cond": make_model(keys[1], True)}

    input_ids = jax.random.randint(keys[2], (B, S), 0, VOCAB)
    segment_ids = jax.random.randint(keys[3], (B, S), 0, NSEG)
    attention_mask = jnp.ones((B, S), jnp.int32).at[:, S - 3:].set(0)
    ng_token_mask = jax.random.bernoulli(keys[4], 0.8, (B, S, C, S))
    # synthetic gold: one argument index per (batch, predicate, case)
    tgt_idx = jax.random.randint(keys[5], (B, S, C), 0, S)
    target = (jnp.arange(S)[None, None, None, :] == tgt_idx[..., None])     # bool (B,S,C,S)

    result = forward(params, input_ids, attention_mask, segment_ids,
                     ng_token_mask, target, num_iter=NUM_ITER)
    result = jax.block_until_ready(result)

    loss = result[0]
    assert jnp.isfinite(loss)
    assert len(result) == 2 + NUM_ITER          # loss + initial + num_iter refinements
    for o in result[1:]:
        assert o.shape == (B, S, C, S)
    print("KERNEL_OK")
</pallas_src>

<mosaic_0001>
module attributes {stable_mosaic.version = 11 : i64} {
  func.func @_fused_pas_kernel(%arg0: i32, %arg1: i32, %arg2: memref<4xf32, #tpu.memory_space<smem>>, %arg3: memref<1x16x32xbf16, #tpu.memory_space<vmem>>, %arg4: memref<32x512xbf16, #tpu.memory_space<vmem>>, %arg5: memref<1x16x512xbf16, #tpu.memory_space<vmem>>, %arg6: memref<1x16x32xbf16, #tpu.memory_space<vmem>>, %arg7: memref<32x512xbf16, #tpu.memory_space<vmem>>, %arg8: memref<1x16x512xbf16, #tpu.memory_space<vmem>>, %arg9: memref<1x4x16x16xbf16, #tpu.memory_space<vmem>>, %arg10: memref<1x4x16x16xbf16, #tpu.memory_space<vmem>>, %arg11: memref<1x4x16x16xbf16, #tpu.memory_space<vmem>>, %arg12: memref<1x4x16x16xbf16, #tpu.memory_space<vmem>>, %arg13: memref<1x4x16x16xbf16, #tpu.memory_space<vmem>>, %arg14: memref<1x1x3x1xf32, #tpu.memory_space<vmem>>) attributes {dimension_semantics = [#tpu.dimension_semantics<parallel>, #tpu.dimension_semantics<parallel>], iteration_bounds = array<i64: 2, 1>, scalar_prefetch = 1 : i64, scratch_operands = 0 : i64, tpu.core_type = #tpu.core_type<tc>, window_params = [{transform_indices = @transform_0, window_bounds = array<i64: 1, 16, 32>}, {pipeline_mode = #tpu.pipeline_mode<synchronous>, transform_indices = @transform_1, window_bounds = array<i64: 32, 512>}, {transform_indices = @transform_2, window_bounds = array<i64: 1, 16, 512>}, {transform_indices = @transform_3, window_bounds = array<i64: 1, 16, 32>}, {pipeline_mode = #tpu.pipeline_mode<synchronous>, transform_indices = @transform_4, window_bounds = array<i64: 32, 512>}, {transform_indices = @transform_5, window_bounds = array<i64: 1, 16, 512>}, {transform_indices = @transform_6, window_bounds = array<i64: 1, 4, 16, 16>}, {transform_indices = @transform_7, window_bounds = array<i64: 1, 4, 16, 16>}, {transform_indices = @transform_8, window_bounds = array<i64: 1, 4, 16, 16>}, {transform_indices = @transform_9, window_bounds = array<i64: 1, 4, 16, 16>}, {transform_indices = @transform_10, window_bounds = array<i64: 1, 4, 16, 16>}, {transform_indices = @transform_11, window_bounds = array<i64: 1, 1, 3, 1>}]} {
    %c0 = arith.constant 0 : index
    %c0_0 = arith.constant 0 : index
    %c0_1 = arith.constant 0 : index
    %0 = vector.load %arg3[%c0, %c0_0, %c0_1] : memref<1x16x32xbf16, #tpu.memory_space<vmem>>, vector<1x16x32xbf16>
    %1 = vector.shape_cast %0 : vector<1x16x32xbf16> to vector<16x32xbf16>
    %c0_2 = arith.constant 0 : index
    %c0_3 = arith.constant 0 : index
    %2 = vector.load %arg4[%c0_2, %c0_3] : memref<32x512xbf16, #tpu.memory_space<vmem>>, vector<32x512xbf16>
    %cst = arith.constant dense<0.000000e+00> : vector<16x512xf32>
    %3 = tpu.matmul %1, %2, %cst {dimension_numbers = #tpu.dot_dimension_numbers<[1], [0], [0], [1], [0, 0, 1, 1], [], []>} : vector<16x32xbf16>, vector<32x512xbf16>, vector<16x512xf32> -> vector<16x512xf32>
    %4 = math.tanh %3 : vector<16x512xf32>
    %5 = arith.truncf %4 : vector<16x512xf32> to vector<16x512xbf16>
    %c0_4 = arith.constant 0 : index
    %c0_5 = arith.constant 0 : index
    %c0_6 = arith.constant 0 : index
    %6 = vector.load %arg6[%c0_4, %c0_5, %c0_6] : memref<1x16x32xbf16, #tpu.memory_space<vmem>>, vector<1x16x32xbf16>
    %7 = vector.shape_cast %6 : vector<1x16x32xbf16> to vector<16x32xbf16>
    %c0_7 = arith.constant 0 : index
    %c0_8 = arith.constant 0 : index
    %8 = vector.load %arg7[%c0_7, %c0_8] : memref<32x512xbf16, #tpu.memory_space<vmem>>, vector<32x512xbf16>
    %cst_9 = arith.constant dense<0.000000e+00> : vector<16x512xf32>
    %9 = tpu.matmul %7, %8, %cst_9 {dimension_numbers = #tpu.dot_dimension_numbers<[1], [0], [0], [1], [0, 0, 1, 1], [], []>} : vector<16x32xbf16>, vector<32x512xbf16>, vector<16x512xf32> -> vector<16x512xf32>
    %10 = math.tanh %9 : vector<16x512xf32>
    %11 = arith.truncf %10 : vector<16x512xf32> to vector<16x512xbf16>
    %c0_10 = arith.constant 0 : index
    %c0_11 = arith.constant 0 : index
    %c0_12 = arith.constant 0 : index
    %12 = vector.load %arg5[%c0_10, %c0_11, %c0_12] : memref<1x16x512xbf16, #tpu.memory_space<vmem>>, vector<1x16x512xbf16>
    %13 = vector.shape_cast %12 : vector<1x16x512xbf16> to vector<16x512xbf16>
    %c0_13 = arith.constant 0 : index
    %c0_14 = arith.constant 0 : index
    %c0_15 = arith.constant 0 : index
    %14 = vector.load %arg8[%c0_13, %c0_14, %c0_15] : memref<1x16x512xbf16, #tpu.memory_space<vmem>>, vector<1x16x512xbf16>
    %15 = vector.shape_cast %14 : vector<1x16x512xbf16> to vector<16x512xbf16>
    %c0_16 = arith.constant 0 : index
    %c0_17 = arith.constant 0 : index
    %c0_18 = arith.constant 0 : index
    %c0_19 = arith.constant 0 : index
    %16 = vector.load %arg9[%c0_16, %c0_17, %c0_18, %c0_19] : memref<1x4x16x16xbf16, #tpu.memory_space<vmem>>, vector<1x1x16x16xbf16>
    %17 = vector.shape_cast %16 : vector<1x1x16x16xbf16> to vector<16x16xbf16>
    %18 = arith.extf %17 : vector<16x16xbf16> to vector<16x16xf32>
    %c0_20 = arith.constant 0 : index
    %c0_21 = arith.constant 0 : index
    %c0_22 = arith.constant 0 : index
    %c0_23 = arith.constant 0 : index
    %19 = vector.load %arg10[%c0_20, %c0_21, %c0_22, %c0_23] : memref<1x4x16x16xbf16, #tpu.memory_space<vmem>>, vector<1x1x16x16xbf16>
    %20 = vector.shape_cast %19 : vector<1x1x16x16xbf16> to vector<16x16xbf16>
    %21 = arith.extf %20 : vector<16x16xbf16> to vector<16x16xf32>
    %22 = vector.extract_strided_slice %5 {offsets = [0, 0], sizes = [16, 128], strides = [1, 1]} : vector<16x512xbf16> to vector<16x128xbf16>
    %23 = vector.extract_strided_slice %13 {offsets = [0, 0], sizes = [16, 128], strides = [1, 1]} : vector<16x512xbf16> to vector<16x128xbf16>
    %cst_24 = arith.constant dense<0.000000e+00> : vector<16x16xf32>
    %24 = tpu.matmul %22, %23, %cst_24 {dimension_numbers = #tpu.dot_dimension_numbers<[1], [1], [0], [0], [0, 0, 1, 0], [], []>} : vector<16x128xbf16>, vector<16x128xbf16>, vector<16x16xf32> -> vector<16x16xf32>
    %25 = arith.addf %24, %18 : vector<16x16xf32>
    %26 = arith.truncf %25 : vector<16x16xf32> to vector<16x16xbf16>
    %c0_25 = arith.constant 0 : index
    %c0_26 = arith.constant 0 : index
    %c0_27 = arith.constant 0 : index
    %c0_28 = arith.constant 0 : index
    %27 = vector.load %arg11[%c0_25, %c0_26, %c0_27, %c0_28] : memref<1x4x16x16xbf16, #tpu.memory_space<vmem>>, vector<1x1x16x16xbf16>
    %28 = vector.shape_cast %27 : vector<1x1x16x16xbf16> to vector<16x16xbf16>
    %29 = vector.shape_cast %26 : vector<16x16xbf16> to vector<1x1x16x16xbf16>
    tpu.vector_store %arg11[%c0_25, %c0_26, %c0_27, %c0_28], %29 {strides = array<i32>} : memref<1x4x16x16xbf16, #tpu.memory_space<vmem>>, vector<1x1x16x16xbf16>,
    %cst_29 = arith.constant dense<0xFF800000> : vector<16xf32>
    %30 = vector.multi_reduction <maximumf>, %25, %cst_29 [1] : vector<16x16xf32> to vector<16xf32>
    %31 = vector.shape_cast %30 : vector<16xf32> to vector<16x1xf32>
    %32 = vector.broadcast %31 : vector<16x1xf32> to vector<16x16xf32>
    %33 = arith.subf %25, %32 : vector<16x16xf32>
    %34 = math.exp %33 : vector<16x16xf32>
    %cst_30 = arith.constant dense<0.000000e+00> : vector<16xf32>
    %35 = vector.multi_reduction <add>, %34, %cst_30 [1] : vector<16x16xf32> to vector<16xf32>
    %36 = vector.shape_cast %35 : vector<16xf32> to vector<16x1xf32>
    %37 = math.log %36 : vector<16x1xf32>
    %38 = vector.broadcast %37 : vector<16x1xf32> to vector<16x16xf32>
    %39 = arith.subf %33, %38 : vector<16x16xf32>
    %cst_31 = arith.constant 0.000000e+00 : f32
    %40 = vector.broadcast %cst_31 : f32 to vector<16x16xf32>
    %41 = arith.subf %40, %39 : vector<16x16xf32>
    %42 = arith.mulf %41, %21 : vector<16x16xf32>
    %43 = vector.shape_cast %42 : vector<16x16xf32> to vector<1x16x16xf32>
    %cst_32 = arith.constant dense<0.000000e+00> : vector<1xf32>
    %44 = vector.multi_reduction <add>, %43, %cst_32 [1, 2] : vector<1x16x16xf32> to vector<1xf32>
    %45 = vector.shape_cast %44 : vector<1xf32> to vector<1x1x1xf32>
    %46 = vector.extract %45[0, 0, 0] : f32 from vector<1x1x1xf32>
    %47 = tpu.reciprocal %36 {approx = true} : vector<16x1xf32> -> vector<16x1xf32>
    %48 = vector.broadcast %47 : vector<16x1xf32> to vector<16x16xf32>
    %49 = arith.mulf %34, %48 : vector<16x16xf32>
    %cst_33 = arith.constant 0.000000e+00 : f32
    %50 = arith.addf %cst_33, %46 : f32
    %51 = vector.extract_strided_slice %11 {offsets = [0, 0], sizes = [16, 128], strides = [1, 1]} : vector<16x512xbf16> to vector<16x128xbf16>
    %52 = vector.extract_strided_slice %15 {offsets = [0, 0], sizes = [16, 128], strides = [1, 1]} : vector<16x512xbf16> to vector<16x128xbf16>
    %cst_34 = arith.constant dense<0.000000e+00> : vector<16x16xf32>
    %53 = tpu.matmul %51, %52, %cst_34 {dimension_numbers = #tpu.dot_dimension_numbers<[1], [1], [0], [0], [0, 0, 1, 0], [], []>} : vector<16x128xbf16>, vector<16x128xbf16>, vector<16x16xf32> -> vector<16x16xf32>
    %54 = arith.addf %53, %18 : vector<16x16xf32>
    %c0_35 = arith.constant 0 : index
    %55 = memref.load %arg2[%c0_35] : memref<4xf32, #tpu.memory_space<smem>>
    %56 = vector.broadcast %55 : f32 to vector<16x16xf32>
    %57 = arith.mulf %56, %49 : vector<16x16xf32>
    %58 = arith.addf %54, %57 : vector<16x16xf32>
    %59 = arith.truncf %58 : vector<16x16xf32> to vector<16x16xbf16>
    %c0_36 = arith.constant 0 : index
    %c0_37 = arith.constant 0 : index
    %c0_38 = arith.constant 0 : index
    %c0_39 = arith.constant 0 : index
    %60 = vector.load %arg12[%c0_36, %c0_37, %c0_38, %c0_39] : memref<1x4x16x16xbf16, #tpu.memory_space<vmem>>, vector<1x1x16x16xbf16>
    %61 = vector.shape_cast %60 : vector<1x1x16x16xbf16> to vector<16x16xbf16>
    %62 = vector.shape_cast %59 : vector<16x16xbf16> to vector<1x1x16x16xbf16>
    tpu.vector_store %arg12[%c0_36, %c0_37, %c0_38, %c0_39], %62 {strides = array<i32>} : memref<1x4x16x16xbf16, #tpu.memory_space<vmem>>, vector<1x1x16x16xbf16>,
    %cst_40 = arith.constant dense<0xFF800000> : vector<16xf32>
    %63 = vector.multi_reduction <maximumf>, %58, %cst_40 [1] : vector<16x16xf32> to vector<16xf32>
    %64 = vector.shape_cast %63 : vector<16xf32> to vector<16x1xf32>
    %65 = vector.broadcast %64 : vector<16x1xf32> to vector<16x16xf32>
    %66 = arith.subf %58, %65 : vector<16x16xf32>
    %67 = math.exp %66 : vector<16x16xf32>
    %cst_41 = arith.constant dense<0.000000e+00> : vector<16xf32>
    %68 = vector.multi_reduction <add>, %67, %cst_41 [1] : vector<16x16xf32> to vector<16xf32>
    %69 = vector.shape_cast %68 : vector<16xf32> to vector<16x1xf32>
    %70 = math.log %69 : vector<16x1xf32>
    %71 = vector.broadcast %70 : vector<16x1xf32> to vector<16x16xf32>
    %72 = arith.subf %66, %71 : vector<16x16xf32>
    %cst_42 = arith.constant 0.000000e+00 : f32
    %73 = vector.broadcast %cst_42 : f32 to vector<16x16xf32>
    %74 = arith.subf %73, %72 : vector<16x16xf32>
    %75 = arith.mulf %74, %21 : vector<16x16xf32>
    %76 = vector.shape_cast %75 : vector<16x16xf32> to vector<1x16x16xf32>
    %cst_43 = arith.constant dense<0.000000e+00> : vector<1xf32>
    %77 = vector.multi_reduction <add>, %76, %cst_43 [1, 2] : vector<1x16x16xf32> to vector<1xf32>
    %78 = vector.shape_cast %77 : vector<1xf32> to vector<1x1x1xf32>
    %79 = vector.extract %78[0, 0, 0] : f32 from vector<1x1x1xf32>
    %80 = tpu.reciprocal %69 {approx = true} : vector<16x1xf32> -> vector<16x1xf32>
    %81 = vector.broadcast %80 : vector<16x1xf32> to vector<16x16xf32>
    %82 = arith.mulf %67, %81 : vector<16x16xf32>
    %cst_44 = arith.constant 0.000000e+00 : f32
    %83 = arith.addf %cst_44, %79 : f32
    %c0_45 = arith.constant 0 : index
    %84 = memref.load %arg2[%c0_45] : memref<4xf32, #tpu.memory_space<smem>>
    %85 = vector.broadcast %84 : f32 to vector<16x16xf32>
    %86 = arith.mulf %85, %82 : vector<16x16xf32>
    %87 = arith.addf %54, %86 : vector<16x16xf32>
    %88 = arith.truncf %87 : vector<16x16xf32> to vector<16x16xbf16>
    %c0_46 = arith.constant 0 : index
    %c0_47 = arith.constant 0 : index
    %c0_48 = arith.constant 0 : index
    %c0_49 = arith.constant 0 : index
    %89 = vector.load %arg13[%c0_46, %c0_47, %c0_48, %c0_49] : memref<1x4x16x16xbf16, #tpu.memory_space<vmem>>, vector<1x1x16x16xbf16>
    %90 = vector.shape_cast %89 : vector<1x1x16x16xbf16> to vector<16x16xbf16>
    %91 = vector.shape_cast %88 : vector<16x16xbf16> to vector<1x1x16x16xbf16>
    tpu.vector_store %arg13[%c0_46, %c0_47, %c0_48, %c0_49], %91 {strides = array<i32>} : memref<1x4x16x16xbf16, #tpu.memory_space<vmem>>, vector<1x1x16x16xbf16>,
    %cst_50 = arith.constant dense<0xFF800000> : vector<16xf32>
    %92 = vector.multi_reduction <maximumf>, %87, %cst_50 [1] : vector<16x16xf32> to vector<16xf32>
    %93 = vector.shape_cast %92 : vector<16xf32> to vector<16x1xf32>
    %94 = vector.broadcast %93 : vector<16x1xf32> to vector<16x16xf32>
    %95 = arith.subf %87, %94 : vector<16x16xf32>
    %96 = math.exp %95 : vector<16x16xf32>
    %cst_51 = arith.constant dense<0.000000e+00> : vector<16xf32>
    %97 = vector.multi_reduction <add>, %96, %cst_51 [1] : vector<16x16xf32> to vector<16xf32>
    %98 = vector.shape_cast %97 : vector<16xf32> to vector<16x1xf32>
    %99 = math.log %98 : vector<16x1xf32>
    %100 = vector.broadcast %99 : vector<16x1xf32> to vector<16x16xf32>
    %101 = arith.subf %95, %100 : vector<16x16xf32>
    %cst_52 = arith.constant 0.000000e+00 : f32
    %102 = vector.broadcast %cst_52 : f32 to vector<16x16xf32>
    %103 = arith.subf %102, %101 : vector<16x16xf32>
    %104 = arith.mulf %103, %21 : vector<16x16xf32>
    %105 = vector.shape_cast %104 : vector<16x16xf32> to vector<1x16x16xf32>
    %cst_53 = arith.constant dense<0.000000e+00> : vector<1xf32>
    %106 = vector.multi_reduction <add>, %105, %cst_53 [1, 2] : vector<1x16x16xf32> to vector<1xf32>
    %107 = vector.shape_cast %106 : vector<1xf32> to vector<1x1x1xf32>
    %108 = vector.extract %107[0, 0, 0] : f32 from vector<1x1x1xf32>
    %cst_54 = arith.constant 0.000000e+00 : f32
    %109 = arith.addf %cst_54, %108 : f32
    %c0_55 = arith.constant 0 : index
    %c1 = arith.constant 1 : index
    %c0_56 = arith.constant 0 : index
    %c0_57 = arith.constant 0 : index
    %110 = vector.load %arg9[%c0_55, %c1, %c0_56, %c0_57] : memref<1x4x16x16xbf16, #tpu.memory_space<vmem>>, vector<1x1x16x16xbf16>
    %111 = vector.shape_cast %110 : vector<1x1x16x16xbf16> to vector<16x16xbf16>
    %112 = arith.extf %111 : vector<16x16xbf16> to vector<16x16xf32>
    %c0_58 = arith.constant 0 : index
    %c1_59 = arith.constant 1 : index
    %c0_60 = arith.constant 0 : index
    %c0_61 = arith.constant 0 : index
    %113 = vector.load %arg10[%c0_58, %c1_59, %c0_60, %c0_61] : memref<1x4x16x16xbf16, #tpu.memory_space<vmem>>, vector<1x1x16x16xbf16>
    %114 = vector.shape_cast %113 : vector<1x1x16x16xbf16> to vector<16x16xbf16>
    %115 = arith.extf %114 : vector<16x16xbf16> to vector<16x16xf32>
    %116 = vector.extract_strided_slice %5 {offsets = [0, 128], sizes = [16, 128], strides = [1, 1]} : vector<16x512xbf16> to vector<16x128xbf16>
    %117 = vector.extract_strided_slice %13 {offsets = [0, 128], sizes = [16, 128], strides = [1, 1]} : vector<16x512xbf16> to vector<16x128xbf16>
    %cst_62 = arith.constant dense<0.000000e+00> : vector<16x16xf32>
    %118 = tpu.matmul %116, %117, %cst_62 {dimension_numbers = #tpu.dot_dimension_numbers<[1], [1], [0], [0], [0, 0, 1, 0], [], []>} : vector<16x128xbf16>, vector<16x128xbf16>, vector<16x16xf32> -> vector<16x16xf32>
    %119 = arith.addf %118, %112 : vector<16x16xf32>
    %120 = arith.truncf %119 : vector<16x16xf32> to vector<16x16xbf16>
    %c0_63 = arith.constant 0 : index
    %c1_64 = arith.constant 1 : index
    %c0_65 = arith.constant 0 : index
    %c0_66 = arith.constant 0 : index
    %121 = vector.load %arg11[%c0_63, %c1_64, %c0_65, %c0_66] : memref<1x4x16x16xbf16, #tpu.memory_space<vmem>>, vector<1x1x16x16xbf16>
    %122 = vector.shape_cast %121 : vector<1x1x16x16xbf16> to vector<16x16xbf16>
    %123 = vector.shape_cast %120 : vector<16x16xbf16> to vector<1x1x16x16xbf16>
    tpu.vector_store %arg11[%c0_63, %c1_64, %c0_65, %c0_66], %123 {strides = array<i32>} : memref<1x4x16x16xbf16, #tpu.memory_space<vmem>>, vector<1x1x16x16xbf16>,
    %cst_67 = arith.constant dense<0xFF800000> : vector<16xf32>
    %124 = vector.multi_reduction <maximumf>, %119, %cst_67 [1] : vector<16x16xf32> to vector<16xf32>
    %125 = vector.shape_cast %124 : vector<16xf32> to vector<16x1xf32>
    %126 = vector.broadcast %125 : vector<16x1xf32> to vector<16x16xf32>
    %127 = arith.subf %119, %126 : vector<16x16xf32>
    %128 = math.exp %127 : vector<16x16xf32>
    %cst_68 = arith.constant dense<0.000000e+00> : vector<16xf32>
    %129 = vector.multi_reduction <add>, %128, %cst_68 [1] : vector<16x16xf32> to vector<16xf32>
    %130 = vector.shape_cast %129 : vector<16xf32> to vector<16x1xf32>
    %131 = math.log %130 : vector<16x1xf32>
    %132 = vector.broadcast %131 : vector<16x1xf32> to vector<16x16xf32>
    %133 = arith.subf %127, %132 : vector<16x16xf32>
    %cst_69 = arith.constant 0.000000e+00 : f32
    %134 = vector.broadcast %cst_69 : f32 to vector<16x16xf32>
    %135 = arith.subf %134, %133 : vector<16x16xf32>
    %136 = arith.mulf %135, %115 : vector<16x16xf32>
    %137 = vector.shape_cast %136 : vector<16x16xf32> to vector<1x16x16xf32>
    %cst_70 = arith.constant dense<0.000000e+00> : vector<1xf32>
    %138 = vector.multi_reduction <add>, %137, %cst_70 [1, 2] : vector<1x16x16xf32> to vector<1xf32>
    %139 = vector.shape_cast %138 : vector<1xf32> to vector<1x1x1xf32>
    %140 = vector.extract %139[0, 0, 0] : f32 from vector<1x1x1xf32>
    %141 = tpu.reciprocal %130 {approx = true} : vector<16x1xf32> -> vector<16x1xf32>
    %142 = vector.broadcast %141 : vector<16x1xf32> to vector<16x16xf32>
    %143 = arith.mulf %128, %142 : vector<16x16xf32>
    %144 = arith.addf %50, %140 : f32
    %145 = vector.extract_strided_slice %11 {offsets = [0, 128], sizes = [16, 128], strides = [1, 1]} : vector<16x512xbf16> to vector<16x128xbf16>
    %146 = vector.extract_strided_slice %15 {offsets = [0, 128], sizes = [16, 128], strides = [1, 1]} : vector<16x512xbf16> to vector<16x128xbf16>
    %cst_71 = arith.constant dense<0.000000e+00> : vector<16x16xf32>
    %147 = tpu.matmul %145, %146, %cst_71 {dimension_numbers = #tpu.dot_dimension_numbers<[1], [1], [0], [0], [0, 0, 1, 0], [], []>} : vector<16x128xbf16>, vector<16x128xbf16>, vector<16x16xf32> -> vector<16x16xf32>
    %148 = arith.addf %147, %112 : vector<16x16xf32>
    %c1_72 = arith.constant 1 : index
    %149 = memref.load %arg2[%c1_72] : memref<4xf32, #tpu.memory_space<smem>>
    %150 = vector.broadcast %149 : f32 to vector<16x16xf32>
    %151 = arith.mulf %150, %143 : vector<16x16xf32>
    %152 = arith.addf %148, %151 : vector<16x16xf32>
    %153 = arith.truncf %152 : vector<16x16xf32> to vector<16x16xbf16>
    %c0_73 = arith.constant 0 : index
    %c1_74 = arith.constant 1 : index
    %c0_75 = arith.constant 0 : index
    %c0_76 = arith.constant 0 : index
    %154 = vector.load %arg12[%c0_73, %c1_74, %c0_75, %c0_76] : memref<1x4x16x16xbf16, #tpu.memory_space<vmem>>, vector<1x1x16x16xbf16>
    %155 = vector.shape_cast %154 : vector<1x1x16x16xbf16> to vector<16x16xbf16>
    %156 = vector.shape_cast %153 : vector<16x16xbf16> to vector<1x1x16x16xbf16>
    tpu.vector_store %arg12[%c0_73, %c1_74, %c0_75, %c0_76], %156 {strides = array<i32>} : memref<1x4x16x16xbf16, #tpu.memory_space<vmem>>, vector<1x1x16x16xbf16>,
    %cst_77 = arith.constant dense<0xFF800000> : vector<16xf32>
    %157 = vector.multi_reduction <maximumf>, %152, %cst_77 [1] : vector<16x16xf32> to vector<16xf32>
    %158 = vector.shape_cast %157 : vector<16xf32> to vector<16x1xf32>
    %159 = vector.broadcast %158 : vector<16x1xf32> to vector<16x16xf32>
    %160 = arith.subf %152, %159 : vector<16x16xf32>
    %161 = math.exp %160 : vector<16x16xf32>
    %cst_78 = arith.constant dense<0.000000e+00> : vector<16xf32>
    %162 = vector.multi_reduction <add>, %161, %cst_78 [1] : vector<16x16xf32> to vector<16xf32>
    %163 = vector.shape_cast %162 : vector<16xf32> to vector<16x1xf32>
    %164 = math.log %163 : vector<16x1xf32>
    %165 = vector.broadcast %164 : vector<16x1xf32> to vector<16x16xf32>
    %166 = arith.subf %160, %165 : vector<16x16xf32>
    %cst_79 = arith.constant 0.000000e+00 : f32
    %167 = vector.broadcast %cst_79 : f32 to vector<16x16xf32>
    %168 = arith.subf %167, %166 : vector<16x16xf32>
    %169 = arith.mulf %168, %115 : vector<16x16xf32>
    %170 = vector.shape_cast %169 : vector<16x16xf32> to vector<1x16x16xf32>
    %cst_80 = arith.constant dense<0.000000e+00> : vector<1xf32>
    %171 = vector.multi_reduction <add>, %170, %cst_80 [1, 2] : vector<1x16x16xf32> to vector<1xf32>
    %172 = vector.shape_cast %171 : vector<1xf32> to vector<1x1x1xf32>
    %173 = vector.extract %172[0, 0, 0] : f32 from vector<1x1x1xf32>
    %174 = tpu.reciprocal %163 {approx = true} : vector<16x1xf32> -> vector<16x1xf32>
    %175 = vector.broadcast %174 : vector<16x1xf32> to vector<16x16xf32>
    %176 = arith.mulf %161, %175 : vector<16x16xf32>
    %177 = arith.addf %83, %173 : f32
    %c1_81 = arith.constant 1 : index
    %178 = memref.load %arg2[%c1_81] : memref<4xf32, #tpu.memory_space<smem>>
    %179 = vector.broadcast %178 : f32 to vector<16x16xf32>
    %180 = arith.mulf %179, %176 : vector<16x16xf32>
    %181 = arith.addf %148, %180 : vector<16x16xf32>
    %182 = arith.truncf %181 : vector<16x16xf32> to vector<16x16xbf16>
    %c0_82 = arith.constant 0 : index
    %c1_83 = arith.constant 1 : index
    %c0_84 = arith.constant 0 : index
    %c0_85 = arith.constant 0 : index
    %183 = vector.load %arg13[%c0_82, %c1_83, %c0_84, %c0_85] : memref<1x4x16x16xbf16, #tpu.memory_space<vmem>>, vector<1x1x16x16xbf16>
    %184 = vector.shape_cast %183 : vector<1x1x16x16xbf16> to vector<16x16xbf16>
    %185 = vector.shape_cast %182 : vector<16x16xbf16> to vector<1x1x16x16xbf16>
    tpu.vector_store %arg13[%c0_82, %c1_83, %c0_84, %c0_85], %185 {strides = array<i32>} : memref<1x4x16x16xbf16, #tpu.memory_space<vmem>>, vector<1x1x16x16xbf16>,
    %cst_86 = arith.constant dense<0xFF800000> : vector<16xf32>
    %186 = vector.multi_reduction <maximumf>, %181, %cst_86 [1] : vector<16x16xf32> to vector<16xf32>
    %187 = vector.shape_cast %186 : vector<16xf32> to vector<16x1xf32>
    %188 = vector.broadcast %187 : vector<16x1xf32> to vector<16x16xf32>
    %189 = arith.subf %181, %188 : vector<16x16xf32>
    %190 = math.exp %189 : vector<16x16xf32>
    %cst_87 = arith.constant dense<0.000000e+00> : vector<16xf32>
    %191 = vector.multi_reduction <add>, %190, %cst_87 [1] : vector<16x16xf32> to vector<16xf32>
    %192 = vector.shape_cast %191 : vector<16xf32> to vector<16x1xf32>
    %193 = math.log %192 : vector<16x1xf32>
    %194 = vector.broadcast %193 : vector<16x1xf32> to vector<16x16xf32>
    %195 = arith.subf %189, %194 : vector<16x16xf32>
    %cst_88 = arith.constant 0.000000e+00 : f32
    %196 = vector.broadcast %cst_88 : f32 to vector<16x16xf32>
    %197 = arith.subf %196, %195 : vector<16x16xf32>
    %198 = arith.mulf %197, %115 : vector<16x16xf32>
    %199 = vector.shape_cast %198 : vector<16x16xf32> to vector<1x16x16xf32>
    %cst_89 = arith.constant dense<0.000000e+00> : vector<1xf32>
    %200 = vector.multi_reduction <add>, %199, %cst_89 [1, 2] : vector<1x16x16xf32> to vector<1xf32>
    %201 = vector.shape_cast %200 : vector<1xf32> to vector<1x1x1xf32>
    %202 = vector.extract %201[0, 0, 0] : f32 from vector<1x1x1xf32>
    %203 = arith.addf %109, %202 : f32
    %c0_90 = arith.constant 0 : index
    %c2 = arith.constant 2 : index
    %c0_91 = arith.constant 0 : index
    %c0_92 = arith.constant 0 : index
    %204 = vector.load %arg9[%c0_90, %c2, %c0_91, %c0_92] : memref<1x4x16x16xbf16, #tpu.memory_space<vmem>>, vector<1x1x16x16xbf16>
    %205 = vector.shape_cast %204 : vector<1x1x16x16xbf16> to vector<16x16xbf16>
    %206 = arith.extf %205 : vector<16x16xbf16> to vector<16x16xf32>
    %c0_93 = arith.constant 0 : index
    %c2_94 = arith.constant 2 : index
    %c0_95 = arith.constant 0 : index
    %c0_96 = arith.constant 0 : index
    %207 = vector.load %arg10[%c0_93, %c2_94, %c0_95, %c0_96] : memref<1x4x16x16xbf16, #tpu.memory_space<vmem>>, vector<1x1x16x16xbf16>
    %208 = vector.shape_cast %207 : vector<1x1x16x16xbf16> to vector<16x16xbf16>
    %209 = arith.extf %208 : vector<16x16xbf16> to vector<16x16xf32>
    %210 = vector.extract_strided_slice %5 {offsets = [0, 256], sizes = [16, 128], strides = [1, 1]} : vector<16x512xbf16> to vector<16x128xbf16>
    %211 = vector.extract_strided_slice %13 {offsets = [0, 256], sizes = [16, 128], strides = [1, 1]} : vector<16x512xbf16> to vector<16x128xbf16>
    %cst_97 = arith.constant dense<0.000000e+00> : vector<16x16xf32>
    %212 = tpu.matmul %210, %211, %cst_97 {dimension_numbers = #tpu.dot_dimension_numbers<[1], [1], [0], [0], [0, 0, 1, 0], [], []>} : vector<16x128xbf16>, vector<16x128xbf16>, vector<16x16xf32> -> vector<16x16xf32>
    %213 = arith.addf %212, %206 : vector<16x16xf32>
    %214 = arith.truncf %213 : vector<16x16xf32> to vector<16x16xbf16>
    %c0_98 = arith.constant 0 : index
    %c2_99 = arith.constant 2 : index
    %c0_100 = arith.constant 0 : index
    %c0_101 = arith.constant 0 : index
    %215 = vector.load %arg11[%c0_98, %c2_99, %c0_100, %c0_101] : memref<1x4x16x16xbf16, #tpu.memory_space<vmem>>, vector<1x1x16x16xbf16>
    %216 = vector.shape_cast %215 : vector<1x1x16x16xbf16> to vector<16x16xbf16>
    %217 = vector.shape_cast %214 : vector<16x16xbf16> to vector<1x1x16x16xbf16>
    tpu.vector_store %arg11[%c0_98, %c2_99, %c0_100, %c0_101], %217 {strides = array<i32>} : memref<1x4x16x16xbf16, #tpu.memory_space<vmem>>, vector<1x1x16x16xbf16>,
    %cst_102 = arith.constant dense<0xFF800000> : vector<16xf32>
    %218 = vector.multi_reduction <maximumf>, %213, %cst_102 [1] : vector<16x16xf32> to vector<16xf32>
    %219 = vector.shape_cast %218 : vector<16xf32> to vector<16x1xf32>
    %220 = vector.broadcast %219 : vector<16x1xf32> to vector<16x16xf32>
    %221 = arith.subf %213, %220 : vector<16x16xf32>
    %222 = math.exp %221 : vector<16x16xf32>
    %cst_103 = arith.constant dense<0.000000e+00> : vector<16xf32>
    %223 = vector.multi_reduction <add>, %222, %cst_103 [1] : vector<16x16xf32> to vector<16xf32>
    %224 = vector.shape_cast %223 : vector<16xf32> to vector<16x1xf32>
    %225 = math.log %224 : vector<16x1xf32>
    %226 = vector.broadcast %225 : vector<16x1xf32> to vector<16x16xf32>
    %227 = arith.subf %221, %226 : vector<16x16xf32>
    %cst_104 = arith.constant 0.000000e+00 : f32
    %228 = vector.broadcast %cst_104 : f32 to vector<16x16xf32>
    %229 = arith.subf %228, %227 : vector<16x16xf32>
    %230 = arith.mulf %229, %209 : vector<16x16xf32>
    %231 = vector.shape_cast %230 : vector<16x16xf32> to vector<1x16x16xf32>
    %cst_105 = arith.constant dense<0.000000e+00> : vector<1xf32>
    %232 = vector.multi_reduction <add>, %231, %cst_105 [1, 2] : vector<1x16x16xf32> to vector<1xf32>
    %233 = vector.shape_cast %232 : vector<1xf32> to vector<1x1x1xf32>
    %234 = vector.extract %233[0, 0, 0] : f32 from vector<1x1x1xf32>
    %235 = tpu.reciprocal %224 {approx = true} : vector<16x1xf32> -> vector<16x1xf32>
    %236 = vector.broadcast %235 : vector<16x1xf32> to vector<16x16xf32>
    %237 = arith.mulf %222, %236 : vector<16x16xf32>
    %238 = arith.addf %144, %234 : f32
    %239 = vector.extract_strided_slice %11 {offsets = [0, 256], sizes = [16, 128], strides = [1, 1]} : vector<16x512xbf16> to vector<16x128xbf16>
    %240 = vector.extract_strided_slice %15 {offsets = [0, 256], sizes = [16, 128], strides = [1, 1]} : vector<16x512xbf16> to vector<16x128xbf16>
    %cst_106 = arith.constant dense<0.000000e+00> : vector<16x16xf32>
    %241 = tpu.matmul %239, %240, %cst_106 {dimension_numbers = #tpu.dot_dimension_numbers<[1], [1], [0], [0], [0, 0, 1, 0], [], []>} : vector<16x128xbf16>, vector<16x128xbf16>, vector<16x16xf32> -> vector<16x16xf32>
    %242 = arith.addf %241, %206 : vector<16x16xf32>
    %c2_107 = arith.constant 2 : index
    %243 = memref.load %arg2[%c2_107] : memref<4xf32, #tpu.memory_space<smem>>
    %244 = vector.broadcast %243 : f32 to vector<16x16xf32>
    %245 = arith.mulf %244, %237 : vector<16x16xf32>
    %246 = arith.addf %242, %245 : vector<16x16xf32>
    %247 = arith.truncf %246 : vector<16x16xf32> to vector<16x16xbf16>
    %c0_108 = arith.constant 0 : index
    %c2_109 = arith.constant 2 : index
    %c0_110 = arith.constant 0 : index
    %c0_111 = arith.constant 0 : index
    %248 = vector.load %arg12[%c0_108, %c2_109, %c0_110, %c0_111] : memref<1x4x16x16xbf16, #tpu.memory_space<vmem>>, vector<1x1x16x16xbf16>
    %249 = vector.shape_cast %248 : vector<1x1x16x16xbf16> to vector<16x16xbf16>
    %250 = vector.shape_cast %247 : vector<16x16xbf16> to vector<1x1x16x16xbf16>
    tpu.vector_store %arg12[%c0_108, %c2_109, %c0_110, %c0_111], %250 {strides = array<i32>} : memref<1x4x16x16xbf16, #tpu.memory_space<vmem>>, vector<1x1x16x16xbf16>,
    %cst_112 = arith.constant dense<0xFF800000> : vector<16xf32>
    %251 = vector.multi_reduction <maximumf>, %246, %cst_112 [1] : vector<16x16xf32> to vector<16xf32>
    %252 = vector.shape_cast %251 : vector<16xf32> to vector<16x1xf32>
    %253 = vector.broadcast %252 : vector<16x1xf32> to vector<16x16xf32>
    %254 = arith.subf %246, %253 : vector<16x16xf32>
    %255 = math.exp %254 : vector<16x16xf32>
    %cst_113 = arith.constant dense<0.000000e+00> : vector<16xf32>
    %256 = vector.multi_reduction <add>, %255, %cst_113 [1] : vector<16x16xf32> to vector<16xf32>
    %257 = vector.shape_cast %256 : vector<16xf32> to vector<16x1xf32>
    %258 = math.log %257 : vector<16x1xf32>
    %259 = vector.broadcast %258 : vector<16x1xf32> to vector<16x16xf32>
    %260 = arith.subf %254, %259 : vector<16x16xf32>
    %cst_114 = arith.constant 0.000000e+00 : f32
    %261 = vector.broadcast %cst_114 : f32 to vector<16x16xf32>
    %262 = arith.subf %261, %260 : vector<16x16xf32>
    %263 = arith.mulf %262, %209 : vector<16x16xf32>
    %264 = vector.shape_cast %263 : vector<16x16xf32> to vector<1x16x16xf32>
    %cst_115 = arith.constant dense<0.000000e+00> : vector<1xf32>
    %265 = vector.multi_reduction <add>, %264, %cst_115 [1, 2] : vector<1x16x16xf32> to vector<1xf32>
    %266 = vector.shape_cast %265 : vector<1xf32> to vector<1x1x1xf32>
    %267 = vector.extract %266[0, 0, 0] : f32 from vector<1x1x1xf32>
    %268 = tpu.reciprocal %257 {approx = true} : vector<16x1xf32> -> vector<16x1xf32>
    %269 = vector.broadcast %268 : vector<16x1xf32> to vector<16x16xf32>
    %270 = arith.mulf %255, %269 : vector<16x16xf32>
    %271 = arith.addf %177, %267 : f32
    %c2_116 = arith.constant 2 : index
    %272 = memref.load %arg2[%c2_116] : memref<4xf32, #tpu.memory_space<smem>>
    %273 = vector.broadcast %272 : f32 to vector<16x16xf32>
    %274 = arith.mulf %273, %270 : vector<16x16xf32>
    %275 = arith.addf %242, %274 : vector<16x16xf32>
    %276 = arith.truncf %275 : vector<16x16xf32> to vector<16x16xbf16>
    %c0_117 = arith.constant 0 : index
    %c2_118 = arith.constant 2 : index
    %c0_119 = arith.constant 0 : index
    %c0_120 = arith.constant 0 : index
    %277 = vector.load %arg13[%c0_117, %c2_118, %c0_119, %c0_120] : memref<1x4x16x16xbf16, #tpu.memory_space<vmem>>, vector<1x1x16x16xbf16>
    %278 = vector.shape_cast %277 : vector<1x1x16x16xbf16> to vector<16x16xbf16>
    %279 = vector.shape_cast %276 : vector<16x16xbf16> to vector<1x1x16x16xbf16>
    tpu.vector_store %arg13[%c0_117, %c2_118, %c0_119, %c0_120], %279 {strides = array<i32>} : memref<1x4x16x16xbf16, #tpu.memory_space<vmem>>, vector<1x1x16x16xbf16>,
    %cst_121 = arith.constant dense<0xFF800000> : vector<16xf32>
    %280 = vector.multi_reduction <maximumf>, %275, %cst_121 [1] : vector<16x16xf32> to vector<16xf32>
    %281 = vector.shape_cast %280 : vector<16xf32> to vector<16x1xf32>
    %282 = vector.broadcast %281 : vector<16x1xf32> to vector<16x16xf32>
    %283 = arith.subf %275, %282 : vector<16x16xf32>
    %284 = math.exp %283 : vector<16x16xf32>
    %cst_122 = arith.constant dense<0.000000e+00> : vector<16xf32>
    %285 = vector.multi_reduction <add>, %284, %cst_122 [1] : vector<16x16xf32> to vector<16xf32>
    %286 = vector.shape_cast %285 : vector<16xf32> to vector<16x1xf32>
    %287 = math.log %286 : vector<16x1xf32>
    %288 = vector.broadcast %287 : vector<16x1xf32> to vector<16x16xf32>
    %289 = arith.subf %283, %288 : vector<16x16xf32>
    %cst_123 = arith.constant 0.000000e+00 : f32
    %290 = vector.broadcast %cst_123 : f32 to vector<16x16xf32>
    %291 = arith.subf %290, %289 : vector<16x16xf32>
    %292 = arith.mulf %291, %209 : vector<16x16xf32>
    %293 = vector.shape_cast %292 : vector<16x16xf32> to vector<1x16x16xf32>
    %cst_124 = arith.constant dense<0.000000e+00> : vector<1xf32>
    %294 = vector.multi_reduction <add>, %293, %cst_124 [1, 2] : vector<1x16x16xf32> to vector<1xf32>
    %295 = vector.shape_cast %294 : vector<1xf32> to vector<1x1x1xf32>
    %296 = vector.extract %295[0, 0, 0] : f32 from vector<1x1x1xf32>
    %297 = arith.addf %203, %296 : f32
    %c0_125 = arith.constant 0 : index
    %c3 = arith.constant 3 : index
    %c0_126 = arith.constant 0 : index
    %c0_127 = arith.constant 0 : index
    %298 = vector.load %arg9[%c0_125, %c3, %c0_126, %c0_127] : memref<1x4x16x16xbf16, #tpu.memory_space<vmem>>, vector<1x1x16x16xbf16>
    %299 = vector.shape_cast %298 : vector<1x1x16x16xbf16> to vector<16x16xbf16>
    %300 = arith.extf %299 : vector<16x16xbf16> to vector<16x16xf32>
    %c0_128 = arith.constant 0 : index
    %c3_129 = arith.constant 3 : index
    %c0_130 = arith.constant 0 : index
    %c0_131 = arith.constant 0 : index
    %301 = vector.load %arg10[%c0_128, %c3_129, %c0_130, %c0_131] : memref<1x4x16x16xbf16, #tpu.memory_space<vmem>>, vector<1x1x16x16xbf16>
    %302 = vector.shape_cast %301 : vector<1x1x16x16xbf16> to vector<16x16xbf16>
    %303 = arith.extf %302 : vector<16x16xbf16> to vector<16x16xf32>
    %304 = vector.extract_strided_slice %5 {offsets = [0, 384], sizes = [16, 128], strides = [1, 1]} : vector<16x512xbf16> to vector<16x128xbf16>
    %305 = vector.extract_strided_slice %13 {offsets = [0, 384], sizes = [16, 128], strides = [1, 1]} : vector<16x512xbf16> to vector<16x128xbf16>
    %cst_132 = arith.constant dense<0.000000e+00> : vector<16x16xf32>
    %306 = tpu.matmul %304, %305, %cst_132 {dimension_numbers = #tpu.dot_dimension_numbers<[1], [1], [0], [0], [0, 0, 1, 0], [], []>} : vector<16x128xbf16>, vector<16x128xbf16>, vector<16x16xf32> -> vector<16x16xf32>
    %307 = arith.addf %306, %300 : vector<16x16xf32>
    %308 = arith.truncf %307 : vector<16x16xf32> to vector<16x16xbf16>
    %c0_133 = arith.constant 0 : index
    %c3_134 = arith.constant 3 : index
    %c0_135 = arith.constant 0 : index
    %c0_136 = arith.constant 0 : index
    %309 = vector.load %arg11[%c0_133, %c3_134, %c0_135, %c0_136] : memref<1x4x16x16xbf16, #tpu.memory_space<vmem>>, vector<1x1x16x16xbf16>
    %310 = vector.shape_cast %309 : vector<1x1x16x16xbf16> to vector<16x16xbf16>
    %311 = vector.shape_cast %308 : vector<16x16xbf16> to vector<1x1x16x16xbf16>
    tpu.vector_store %arg11[%c0_133, %c3_134, %c0_135, %c0_136], %311 {strides = array<i32>} : memref<1x4x16x16xbf16, #tpu.memory_space<vmem>>, vector<1x1x16x16xbf16>,
    %cst_137 = arith.constant dense<0xFF800000> : vector<16xf32>
    %312 = vector.multi_reduction <maximumf>, %307, %cst_137 [1] : vector<16x16xf32> to vector<16xf32>
    %313 = vector.shape_cast %312 : vector<16xf32> to vector<16x1xf32>
    %314 = vector.broadcast %313 : vector<16x1xf32> to vector<16x16xf32>
    %315 = arith.subf %307, %314 : vector<16x16xf32>
    %316 = math.exp %315 : vector<16x16xf32>
    %cst_138 = arith.constant dense<0.000000e+00> : vector<16xf32>
    %317 = vector.multi_reduction <add>, %316, %cst_138 [1] : vector<16x16xf32> to vector<16xf32>
    %318 = vector.shape_cast %317 : vector<16xf32> to vector<16x1xf32>
    %319 = math.log %318 : vector<16x1xf32>
    %320 = vector.broadcast %319 : vector<16x1xf32> to vector<16x16xf32>
    %321 = arith.subf %315, %320 : vector<16x16xf32>
    %cst_139 = arith.constant 0.000000e+00 : f32
    %322 = vector.broadcast %cst_139 : f32 to vector<16x16xf32>
    %323 = arith.subf %322, %321 : vector<16x16xf32>
    %324 = arith.mulf %323, %303 : vector<16x16xf32>
    %325 = vector.shape_cast %324 : vector<16x16xf32> to vector<1x16x16xf32>
    %cst_140 = arith.constant dense<0.000000e+00> : vector<1xf32>
    %326 = vector.multi_reduction <add>, %325, %cst_140 [1, 2] : vector<1x16x16xf32> to vector<1xf32>
    %327 = vector.shape_cast %326 : vector<1xf32> to vector<1x1x1xf32>
    %328 = vector.extract %327[0, 0, 0] : f32 from vector<1x1x1xf32>
    %329 = tpu.reciprocal %318 {approx = true} : vector<16x1xf32> -> vector<16x1xf32>
    %330 = vector.broadcast %329 : vector<16x1xf32> to vector<16x16xf32>
    %331 = arith.mulf %316, %330 : vector<16x16xf32>
    %332 = arith.addf %238, %328 : f32
    %333 = vector.extract_strided_slice %11 {offsets = [0, 384], sizes = [16, 128], strides = [1, 1]} : vector<16x512xbf16> to vector<16x128xbf16>
    %334 = vector.extract_strided_slice %15 {offsets = [0, 384], sizes = [16, 128], strides = [1, 1]} : vector<16x512xbf16> to vector<16x128xbf16>
    %cst_141 = arith.constant dense<0.000000e+00> : vector<16x16xf32>
    %335 = tpu.matmul %333, %334, %cst_141 {dimension_numbers = #tpu.dot_dimension_numbers<[1], [1], [0], [0], [0, 0, 1, 0], [], []>} : vector<16x128xbf16>, vector<16x128xbf16>, vector<16x16xf32> -> vector<16x16xf32>
    %336 = arith.addf %335, %300 : vector<16x16xf32>
    %c3_142 = arith.constant 3 : index
    %337 = memref.load %arg2[%c3_142] : memref<4xf32, #tpu.memory_space<smem>>
    %338 = vector.broadcast %337 : f32 to vector<16x16xf32>
    %339 = arith.mulf %338, %331 : vector<16x16xf32>
    %340 = arith.addf %336, %339 : vector<16x16xf32>
    %341 = arith.truncf %340 : vector<16x16xf32> to vector<16x16xbf16>
    %c0_143 = arith.constant 0 : index
    %c3_144 = arith.constant 3 : index
    %c0_145 = arith.constant 0 : index
    %c0_146 = arith.constant 0 : index
    %342 = vector.load %arg12[%c0_143, %c3_144, %c0_145, %c0_146] : memref<1x4x16x16xbf16, #tpu.memory_space<vmem>>, vector<1x1x16x16xbf16>
    %343 = vector.shape_cast %342 : vector<1x1x16x16xbf16> to vector<16x16xbf16>
    %344 = vector.shape_cast %341 : vector<16x16xbf16> to vector<1x1x16x16xbf16>
    tpu.vector_store %arg12[%c0_143, %c3_144, %c0_145, %c0_146], %344 {strides = array<i32>} : memref<1x4x16x16xbf16, #tpu.memory_space<vmem>>, vector<1x1x16x16xbf16>,
    %cst_147 = arith.constant dense<0xFF800000> : vector<16xf32>
    %345 = vector.multi_reduction <maximumf>, %340, %cst_147 [1] : vector<16x16xf32> to vector<16xf32>
    %346 = vector.shape_cast %345 : vector<16xf32> to vector<16x1xf32>
    %347 = vector.broadcast %346 : vector<16x1xf32> to vector<16x16xf32>
    %348 = arith.subf %340, %347 : vector<16x16xf32>
    %349 = math.exp %348 : vector<16x16xf32>
    %cst_148 = arith.constant dense<0.000000e+00> : vector<16xf32>
    %350 = vector.multi_reduction <add>, %349, %cst_148 [1] : vector<16x16xf32> to vector<16xf32>
    %351 = vector.shape_cast %350 : vector<16xf32> to vector<16x1xf32>
    %352 = math.log %351 : vector<16x1xf32>
    %353 = vector.broadcast %352 : vector<16x1xf32> to vector<16x16xf32>
    %354 = arith.subf %348, %353 : vector<16x16xf32>
    %cst_149 = arith.constant 0.000000e+00 : f32
    %355 = vector.broadcast %cst_149 : f32 to vector<16x16xf32>
    %356 = arith.subf %355, %354 : vector<16x16xf32>
    %357 = arith.mulf %356, %303 : vector<16x16xf32>
    %358 = vector.shape_cast %357 : vector<16x16xf32> to vector<1x16x16xf32>
    %cst_150 = arith.constant dense<0.000000e+00> : vector<1xf32>
    %359 = vector.multi_reduction <add>, %358, %cst_150 [1, 2] : vector<1x16x16xf32> to vector<1xf32>
    %360 = vector.shape_cast %359 : vector<1xf32> to vector<1x1x1xf32>
    %361 = vector.extract %360[0, 0, 0] : f32 from vector<1x1x1xf32>
    %362 = tpu.reciprocal %351 {approx = true} : vector<16x1xf32> -> vector<16x1xf32>
    %363 = vector.broadcast %362 : vector<16x1xf32> to vector<16x16xf32>
    %364 = arith.mulf %349, %363 : vector<16x16xf32>
    %365 = arith.addf %271, %361 : f32
    %c3_151 = arith.constant 3 : index
    %366 = memref.load %arg2[%c3_151] : memref<4xf32, #tpu.memory_space<smem>>
    %367 = vector.broadcast %366 : f32 to vector<16x16xf32>
    %368 = arith.mulf %367, %364 : vector<16x16xf32>
    %369 = arith.addf %336, %368 : vector<16x16xf32>
    %370 = arith.truncf %369 : vector<16x16xf32> to vector<16x16xbf16>
    %c0_152 = arith.constant 0 : index
    %c3_153 = arith.constant 3 : index
    %c0_154 = arith.constant 0 : index
    %c0_155 = arith.constant 0 : index
    %371 = vector.load %arg13[%c0_152, %c3_153, %c0_154, %c0_155] : memref<1x4x16x16xbf16, #tpu.memory_space<vmem>>, vector<1x1x16x16xbf16>
    %372 = vector.shape_cast %371 : vector<1x1x16x16xbf16> to vector<16x16xbf16>
    %373 = vector.shape_cast %370 : vector<16x16xbf16> to vector<1x1x16x16xbf16>
    tpu.vector_store %arg13[%c0_152, %c3_153, %c0_154, %c0_155], %373 {strides = array<i32>} : memref<1x4x16x16xbf16, #tpu.memory_space<vmem>>, vector<1x1x16x16xbf16>,
    %cst_156 = arith.constant dense<0xFF800000> : vector<16xf32>
    %374 = vector.multi_reduction <maximumf>, %369, %cst_156 [1] : vector<16x16xf32> to vector<16xf32>
    %375 = vector.shape_cast %374 : vector<16xf32> to vector<16x1xf32>
    %376 = vector.broadcast %375 : vector<16x1xf32> to vector<16x16xf32>
    %377 = arith.subf %369, %376 : vector<16x16xf32>
    %378 = math.exp %377 : vector<16x16xf32>
    %cst_157 = arith.constant dense<0.000000e+00> : vector<16xf32>
    %379 = vector.multi_reduction <add>, %378, %cst_157 [1] : vector<16x16xf32> to vector<16xf32>
    %380 = vector.shape_cast %379 : vector<16xf32> to vector<16x1xf32>
    %381 = math.log %380 : vector<16x1xf32>
    %382 = vector.broadcast %381 : vector<16x1xf32> to vector<16x16xf32>
    %383 = arith.subf %377, %382 : vector<16x16xf32>
    %cst_158 = arith.constant 0.000000e+00 : f32
    %384 = vector.broadcast %cst_158 : f32 to vector<16x16xf32>
    %385 = arith.subf %384, %383 : vector<16x16xf32>
    %386 = arith.mulf %385, %303 : vector<16x16xf32>
    %387 = vector.shape_cast %386 : vector<16x16xf32> to vector<1x16x16xf32>
    %cst_159 = arith.constant dense<0.000000e+00> : vector<1xf32>
    %388 = vector.multi_reduction <add>, %387, %cst_159 [1, 2] : vector<1x16x16xf32> to vector<1xf32>
    %389 = vector.shape_cast %388 : vector<1xf32> to vector<1x1x1xf32>
    %390 = vector.extract %389[0, 0, 0] : f32 from vector<1x1x1xf32>
    %391 = arith.addf %297, %390 : f32
    %392 = vector.broadcast %332 : f32 to vector<1xf32>
    %393 = vector.broadcast %365 : f32 to vector<1xf32>
    %394 = vector.broadcast %391 : f32 to vector<1xf32>
    %395 = tpu.concatenate %392, %393, %394 in 0 : vector<1xf32>, vector<1xf32>, vector<1xf32> -> vector<3xf32>
    %396 = vector.shape_cast %395 : vector<3xf32> to vector<1x1x3x1xf32>
    %c0_160 = arith.constant 0 : index
    %c0_161 = arith.constant 0 : index
    %c0_162 = arith.constant 0 : index
    %c0_163 = arith.constant 0 : index
    %397 = vector.load %arg14[%c0_160, %c0_161, %c0_162, %c0_163] : memref<1x1x3x1xf32, #tpu.memory_space<vmem>>, vector<1x1x3x1xf32>
    tpu.vector_store %arg14[%c0_160, %c0_161, %c0_162, %c0_163], %396 {strides = array<i32>} : memref<1x1x3x1xf32, #tpu.memory_space<vmem>>, vector<1x1x3x1xf32>,
    return
  }
  func.func @transform_0(%arg0: i32, %arg1: i32, %arg2: memref<4xf32, #tpu.memory_space<smem>>) -> (i32, i32, i32) {
    %c0_i32 = arith.constant 0 : i32
    %c0_i32_0 = arith.constant 0 : i32
    return %arg0, %arg1, %c0_i32 : i32, i32, i32
  }
  func.func @transform_1(%arg0: i32, %arg1: i32, %arg2: memref<4xf32, #tpu.memory_space<smem>>) -> (i32, i32) {
    %c0_i32 = arith.constant 0 : i32
    %c0_i32_0 = arith.constant 0 : i32
    %c0_i32_1 = arith.constant 0 : i32
    return %c0_i32, %c0_i32_0 : i32, i32
  }
  func.func @transform_2(%arg0: i32, %arg1: i32, %arg2: memref<4xf32, #tpu.memory_space<smem>>) -> (i32, i32, i32) {
    %c0_i32 = arith.constant 0 : i32
    %c0_i32_0 = arith.constant 0 : i32
    %c0_i32_1 = arith.constant 0 : i32
    return %arg0, %c0_i32, %c0_i32_0 : i32, i32, i32
  }
  func.func @transform_3(%arg0: i32, %arg1: i32, %arg2: memref<4xf32, #tpu.memory_space<smem>>) -> (i32, i32, i32) {
    %c0_i32 = arith.constant 0 : i32
    %c0_i32_0 = arith.constant 0 : i32
    return %arg0, %arg1, %c0_i32 : i32, i32, i32
  }
  func.func @transform_4(%arg0: i32, %arg1: i32, %arg2: memref<4xf32, #tpu.memory_space<smem>>) -> (i32, i32) {
    %c0_i32 = arith.constant 0 : i32
    %c0_i32_0 = arith.constant 0 : i32
    %c0_i32_1 = arith.constant 0 : i32
    return %c0_i32, %c0_i32_0 : i32, i32
  }
  func.func @transform_5(%arg0: i32, %arg1: i32, %arg2: memref<4xf32, #tpu.memory_space<smem>>) -> (i32, i32, i32) {
    %c0_i32 = arith.constant 0 : i32
    %c0_i32_0 = arith.constant 0 : i32
    %c0_i32_1 = arith.constant 0 : i32
    return %arg0, %c0_i32, %c0_i32_0 : i32, i32, i32
  }
  func.func @transform_6(%arg0: i32, %arg1: i32, %arg2: memref<4xf32, #tpu.memory_space<smem>>) -> (i32, i32, i32, i32) {
    %c0_i32 = arith.constant 0 : i32
    %c0_i32_0 = arith.constant 0 : i32
    %c0_i32_1 = arith.constant 0 : i32
    return %arg0, %c0_i32, %arg1, %c0_i32_0 : i32, i32, i32, i32
  }
  func.func @transform_7(%arg0: i32, %arg1: i32, %arg2: memref<4xf32, #tpu.memory_space<smem>>) -> (i32, i32, i32, i32) {
    %c0_i32 = arith.constant 0 : i32
    %c0_i32_0 = arith.constant 0 : i32
    %c0_i32_1 = arith.constant 0 : i32
    return %arg0, %c0_i32, %arg1, %c0_i32_0 : i32, i32, i32, i32
  }
  func.func @transform_8(%arg0: i32, %arg1: i32, %arg2: memref<4xf32, #tpu.memory_space<smem>>) -> (i32, i32, i32, i32) {
    %c0_i32 = arith.constant 0 : i32
    %c0_i32_0 = arith.constant 0 : i32
    %c0_i32_1 = arith.constant 0 : i32
    return %arg0, %c0_i32, %arg1, %c0_i32_0 : i32, i32, i32, i32
  }
  func.func @transform_9(%arg0: i32, %arg1: i32, %arg2: memref<4xf32, #tpu.memory_space<smem>>) -> (i32, i32, i32, i32) {
    %c0_i32 = arith.constant 0 : i32
    %c0_i32_0 = arith.constant 0 : i32
    %c0_i32_1 = arith.constant 0 : i32
    return %arg0, %c0_i32, %arg1, %c0_i32_0 : i32, i32, i32, i32
  }
  func.func @transform_10(%arg0: i32, %arg1: i32, %arg2: memref<4xf32, #tpu.memory_space<smem>>) -> (i32, i32, i32, i32) {
    %c0_i32 = arith.constant 0 : i32
    %c0_i32_0 = arith.constant 0 : i32
    %c0_i32_1 = arith.constant 0 : i32
    return %arg0, %c0_i32, %arg1, %c0_i32_0 : i32, i32, i32, i32
  }
  func.func @transform_11(%arg0: i32, %arg1: i32, %arg2: memref<4xf32, #tpu.memory_space<smem>>) -> (i32, i32, i32, i32) {
    %c0_i32 = arith.constant 0 : i32
    %c0_i32_0 = arith.constant 0 : i32
    %c0_i32_1 = arith.constant 0 : i32
    return %arg0, %arg1, %c0_i32, %c0_i32_0 : i32, i32, i32, i32
  }
}

</mosaic_0001>

<bundles_post_ra>
// kernel: tpu_custom_call.1
= control target key start
LH: loop header
LB: loop body
LE: loop exit
PB: predicated region body
PF: predicated region fallthrough
CT: control target
= control target key end

     0   :  { %s3560_s21 = smov [#allocation3]   ;;  %s4719_s0 = inlined_call_operand.hbm [shape: f32[4], index: 0, kind: input, shape index: {}]   ;;  %s4720_s1 = inlined_call_operand.hbm [shape: bf16[2,16,32], index: 1, kind: input, shape index: {}]   ;;  %s4721_s2 = inlined_call_operand.hbm [shape: bf16[32,512], index: 2, kind: input, shape index: {}]   ;;  %s4722_s3 = inlined_call_operand.hbm [shape: bf16[2,16,512], index: 3, kind: input, shape index: {}]   ;;  %s4723_s4 = inlined_call_operand.hbm [shape: bf16[2,16,32], index: 4, kind: input, shape index: {}]   ;;  %s4724_s5 = inlined_call_operand.hbm [shape: bf16[32,512], index: 5, kind: input, shape index: {}]   ;;  %s4725_s6 = inlined_call_operand.hbm [shape: bf16[2,16,512], index: 6, kind: input, shape index: {}]   ;;  %s4726_s7 = inlined_call_operand.hbm [shape: bf16[2,4,16,16], index: 7, kind: input, shape index: {}]   ;;  %s4727_s8 = inlined_call_operand.hbm [shape: bf16[2,4,16,16], index: 8, kind: input, shape index: {}]   ;;  %s4728_s9 = inlined_call_operand.hbm [shape: bf16[2,4,16,16], index: 9, kind: output, shape index: {0}]   ;;  %s4729_s10 = inlined_call_operand.hbm [shape: bf16[2,4,16,16], index: 10, kind: output, shape index: {1}]   ;;  %s4730_s11 = inlined_call_operand.hbm [shape: bf16[2,4,16,16], index: 11, kind: output, shape index: {2}]   ;;  %s4731_s12 = inlined_call_operand.vmem [shape: f32[2,1,3,1], index: 12, kind: output, shape index: {3}]  }
   0x1   :  { %4758 = sst [smem:[#allocation40_spill]] %s4720_s1 }
   0x2   :  { %4759 = sst [smem:[#allocation41_spill]] %s4721_s2 }
   0x3   :  { %4760 = sst [smem:[#allocation42_spill]] %s4722_s3 }
   0x4   :  { %4761 = sst [smem:[#allocation43_spill]] %s4723_s4 }
   0x5   :  { %4762 = sst [smem:[#allocation44_spill]] %s4724_s5 }
   0x6   :  { %4763 = sst [smem:[#allocation45_spill]] %s4728_s9 }
   0x7   :  { %4764 = sst [smem:[#allocation46_spill]] %s4729_s10 }
   0x8   :  { %4765 = sst [smem:[#allocation47_spill]] %s4730_s11 }
   0x9   :  { %4766 = sst [smem:[#allocation48_spill]] %s4731_s12 }
   0xa   :  { %19 = dma.hbm_to_smem %s4719_s0, 16, %s3560_s21, [#allocation2] }
   0xb   :  { %3502 = dma.done.wait [#allocation2], 16 }
   0xc   :  { %3503 = vsyncadd [#allocation2], 4294967280 }
   0xd   :  { %21 = sfence }
   0xe   :  { %22 = vsyncpa [#allocation5], 0 }
   0xf   :  { %24 = vsyncpa [#allocation5 + $0x1], 0 }
  0x10   :  { %25 = vsyncpa [#allocation8], 0 }
  0x11   :  { %26 = vsyncpa [#allocation13], 0 }
  0x12   :  { %28 = vsyncpa [#allocation13 + $0x1], 0 }
  0x13   :  { %29 = vsyncpa [#allocation16], 0 }
  0x14   :  { %31 = vsyncpa [#allocation16 + $0x1], 0 }
  0x15   :  { %32 = vsyncpa [#allocation6], 0 }
  0x16   :  { %34 = vsyncpa [#allocation6 + $0x1], 0 }
  0x17   :  { %35 = vsyncpa [#allocation19], 0 }
  0x18   :  { %37 = vsyncpa [#allocation19 + $0x1], 0  ;;  %s3649_s24 = smov 0   ;;  %s3651_s25 = smov 0  }
  0x19   :  { %s3653_s26 = smov 0   ;;  %s3655_s0 = smov 0  }
  0x1a   :  { %s3657_s27 = smov 0   ;;  %s3659_s28 = smov 0  }
  0x1b LB: > { %4767 = sst [smem:[#allocation30_spill]] %s3538_s24  ;;  %s55_s29 = sadd.s32 1, %s3554_s27  ;;  %s3558_s28 = sphi %s3659_s28, %s43_s28   ;;  %s3554_s27 = sphi %s3657_s27, %s4825_s27   ;;  %s3550_s0 = sphi %s3655_s0, %s4824_s0   ;;  %s3546_s26 = sphi %s3653_s26, %s4823_s26   ;;  %s3542_s25 = sphi %s3651_s25, %s4822_s25   ;;  %s3538_s24 = sphi %s3649_s24, %s4821_s24  }
  0x1c   : > { %4768 = sst [smem:[#allocation31_spill]] %s3542_s25  ;;  %s64_s30 = sadd.s32 1, %s3546_s26 }
  0x1d   : > { %4769 = sst [smem:[#allocation32_spill]] %s3546_s26  ;;  %p57_p0 = scmp.ge.s32.totalorder %s55_s29, 2 }
  0x1e   : > { %4770 = sst [smem:[#allocation33_spill]] %s3550_s0  ;;  %p71_p1 = scmp.ne.s32.totalorder %s3546_s26, %s3542_s25 }
  0x1f   : > { %4771 = sst [smem:[#allocation34_spill]] %s3554_s27  ;;  %p72_p2 = scmp.eq.s32.totalorder %s3558_s28, 0 }
  0x20   : > { %s4827_s29 = smov (%p57_p0, %s55_s29), 0  ;;  %p2910_p5 = scmp.lt.s32.totalorder %s3558_s28, 2 }
  0x21   : > { %4772 = sst [smem:[#allocation35_spill]] %s4827_s29  ;;  %p73_p4 = por %p72_p2, %p71_p1 }
  0x22   : > { %s59_s13 = ssub.s32 %s3554_s27, %s4827_s29  ;;  %s3695_s15 = sand.u32 1, %s3546_s26  }
  0x23   : > { %p62_p6 = scmp.eq.s32.totalorder %s59_s13, 0  ;;  %s2687_s16 = sshll.u32 %s3554_s27, 7 }
  0x24   : > { %s4733_s18 = sshll.u32 %s3695_s15, 3  ;;  %s4774_s1 = sld [smem:[#allocation40_spill]] }
  0x25   : > { %s3699_s17 = scalar_select %p62_p6, %s3546_s26, %s64_s30  }
  0x26   : > { %p3707_p7 = pnand %p2910_p5, %p73_p4  ;;  %s421_s23 = scalar_lea.vmem [#allocation4], %s4733_s18 }
  0x27   : > { %4773 = sst [smem:[#allocation36_spill]] %s3699_s17  ;;  %s430_s13 = sshll.u32 %s421_s23, 4  ;;  %s431_s13 = int_to_ptr.vmem [resolvable:$true] %s430_s13 }
  0x28   : > { %s3714_s14 = sshll.u32 %s3695_s15, 5  ;;  %s4776_s29 = sand.u32 1, %s3558_s28  }
  0x29   : > { %s3718_s30 = scalar_lea.sflag [#allocation5], %s4776_s29  ;;  %p3722_p8 = pneg %p3707_p7 }
  0x2a   : > { %s429_s21 = scalar_lea.hbm %s4774_s1, %s2687_s16  ;;  %s3193_s19 = scalar_lea.vmem %s431_s13, 128 }
  0x2b   : > { %p3194_p9 = scmp.ne.s32.totalorder %s431_s13, %s3193_s19  ;;  %s3561_s20 = smov [#allocation4]  }
  0x2c   : > { %s3198_s18 = sshll.u32 %s3561_s20, 4  ;;  %s3199_s18 = int_to_ptr.vmem [resolvable:$false] %s3198_s18 }
  0x2d   : > { %p3196_p10 = pnand %p3194_p9, %p3722_p8  ;;  %s3200_s23 = scalar_lea.vmem %s3199_s18, 256 }
  0x2e   : > { %p3201_p12 = scmp.lt.s32.totalorder %s431_s13, %s3199_s18  ;;  %p3202_p13 = scmp.lt.s32.totalorder %s3200_s23, %s3193_s19 }
  0x2f   : > { %p3197_p11 = pneg %p3196_p10 }
  0x30   : > { %p3203_p0 = por %p3202_p13, %p3201_p12 }
  0x32   : > { %p3204_p2 = pnand %p3203_p0, %p3197_p11 }
  0x34   : > { %3207 = shalt.err (!%p3204_p2)
}
  0x35   : > { %s4738_s29 = smov 64   ;;  %s4740_s20 = smov 4  }
  0x36   : > { %2882 = dma.hbm_to_vmem [thread:$0]  (!%p3707_p7), %s429_s21, 128, %s431_s13, %s3718_s30, %s4738_s29, %s4738_s29, %s4740_s20  }
  0x37   : > { %s4778_s4 = sld [smem:[#allocation43_spill]]  ;;  %s4779_s1 = sshll.u32 %s3695_s15, 3 }
  0x38   : > { %s465_s12 = scalar_lea.vmem [#allocation10], %s4779_s1  ;;  %s3746_s11 = sadd.s32 4294967295, %s3558_s28  }
  0x39   : > { %s474_s9 = sshll.u32 %s465_s12, 4  ;;  %s4737_s10 = sadd.s32 4294967294, %s3558_s28   ;;  %s3743_s9 = int_to_ptr.vmem [resolvable:$true] %s474_s9 }
  0x3a   : > { %p77_p4 = scmp.ne.s32.totalorder %s3542_s25, %s3538_s24  ;;  %p4744_p5 = scmp.eq.s32.totalorder %s3746_s11, 0 }
  0x3b   : > { %p281_p6 = scmp.eq.s32.totalorder %s3746_s11, 1  ;;  %p287_p9 = scmp.eq.s32.totalorder %s4737_s10, 1 }
  0x3c   : > { %p3757_p10 = por %p4744_p5, %p77_p4  ;;  %p2551_p11 = scmp.ge.s32.totalorder %s3558_s28, 1 }
  0x3d   : > { %s3739_s23 = scalar_lea.hbm %s4778_s4, %s2687_s16  ;;  %p3765_p12 = por %p281_p6, %p71_p1 }
  0x3e   : > { %s4780_s1 = scalar_select %p3757_p10, 1, 0 }
  0x3f   : > { %s4782_s12 = scalar_select %p3765_p12, 1, 0 }
  0x40   : > { %4781 = sst [smem:[#allocation37_spill]] %s4780_s1  ;;  %p3769_p13 = por %p287_p9, %p77_p4 }
  0x41   : > { %4783 = sst [smem:[#allocation38_spill]] %s4782_s12  ;;  %p378_p0 = scmp.lt.s32.totalorder %s3558_s28, 3 }
  0x42   : > { %s4784_s16 = scalar_select %p3769_p13, 1, 0 }
  0x43   : > { %p3774_p2 = pnand %p2551_p11, %p378_p0  ;;  %s3564_s13 = smov [#allocation7]  }
  0x44   : > { %4785 = sst [smem:[#allocation39_spill]] %s4784_s16  ;;  %s390_s18 = sshll.u32 %s3564_s13, 4  ;;  %s391_s18 = int_to_ptr.vmem [resolvable:$true] %s390_s18 }
  0x45   : > { %p2872_p3 = pneg %p3774_p2  ;;  %s3781_s19 = sshll.u32 %s3554_s27, 9 }
  0x46   : > { %s444_s10 = scalar_lea.vmem [#allocation9], %s3714_s14  ;;  %s4788_s3 = sld [smem:[#allocation42_spill]] }
  0x47   : > { %s451_s29 = sshll.u32 %s444_s10, 4  ;;  %p3786_p1 = pnand %p2872_p3, %p4744_p5  ;;  %s3794_s29 = int_to_ptr.vmem [resolvable:$true] %s451_s29 }
  0x48   : > { %s3219_s13 = scalar_lea.vmem %s391_s18, 1024  ;;  %p3227_p3 = scmp.lt.s32.totalorder %s391_s18, %s391_s18 }
  0x49   : > { %p3210_p4 = pneg %p3786_p1  ;;  %p3220_p6 = scmp.ne.s32.totalorder %s391_s18, %s3219_s13 }
  0x4a   : > { %p3228_p0 = scmp.lt.s32.totalorder %s3219_s13, %s3219_s13 }
  0x4b   : > { %p3222_p9 = pnand %p3220_p6, %p3210_p4 }
  0x4c   : > { %p3229_p5 = por %p3228_p0, %p3227_p3 }
  0x4d   : > { %p3223_p11 = pneg %p3222_p9 }
  0x4f   : > { %p3230_p13 = pnand %p3229_p5, %p3223_p11 }
  0x51   : > { %3233 = shalt.err (!%p3230_p13)
}
  0x52   : > { %s3565_s10 = smov 256   ;;  %s3566_s4 = smov 16  }
  0x53   : > { %s4789_s2 = sld [smem:[#allocation41_spill]]  ;;  %s3247_s27 = scalar_lea.vmem %s3794_s29, 512 }
  0x54   : > { %p3248_p6 = scmp.ne.s32.totalorder %s3794_s29, %s3247_s27  ;;  %s3567_s13 = smov [#allocation9]  }
  0x55   : > { %s3252_s24 = sshll.u32 %s3567_s13, 4  ;;  %s3253_s24 = int_to_ptr.vmem [resolvable:$false] %s3252_s24 }
  0x56   : > { %p3250_p5 = pnand %p3248_p6, %p3722_p8  ;;  %s3254_s12 = scalar_lea.vmem %s3253_s24, 1024 }
  0x57   : > { %p3255_p9 = scmp.lt.s32.totalorder %s3794_s29, %s3253_s24  ;;  %p3256_p11 = scmp.lt.s32.totalorder %s3254_s12, %s3247_s27 }
  0x58   : > { %p3251_p13 = pneg %p3250_p5 }
  0x59   : > { %2875 = dma.hbm_to_vmem [thread:$0]  (!%p3786_p1), %s4789_s2, 1024, %s391_s18, [#allocation8], %s3565_s10, %s3565_s10, %s3566_s4  }
  0x5a   : > { %p3257_p3 = por %p3256_p11, %p3255_p9 }
  0x5c   : > { %p3258_p0 = pnand %p3257_p3, %p3251_p13 }
  0x5e   : > { %3261 = shalt.err (!%p3258_p0)
}
  0x5f   : > { %s4790_s26 = scalar_lea.hbm %s4788_s3, %s3781_s19  ;;  %s494_s12 = scalar_lea.hbm %s4725_s6, %s3781_s19 }
  0x60   : > { %2885 = dma.hbm_to_vmem [thread:$0]  (!%p3707_p7), %s4790_s26, 512, %s3794_s29, %s3718_s30, %s3565_s10, %s3565_s10, %s3566_s4  }
  0x61   : > { %s488_s13 = scalar_lea.vmem [#allocation12], %s3714_s14  ;;  %s4791_s0 = sand.u32 1, %s3558_s28  }
  0x62   : > { %s495_s2 = sshll.u32 %s488_s13, 4  ;;  %s3833_s1 = scalar_lea.sflag [#allocation13], %s4791_s0  ;;  %s496_s2 = int_to_ptr.vmem [resolvable:$true] %s495_s2 }
  0x63   : > { %s3275_s25 = scalar_lea.vmem %s496_s2, 512  ;;  %s3568_s16 = smov [#allocation12]  }
  0x64   : > { %p3276_p6 = scmp.ne.s32.totalorder %s496_s2, %s3275_s25  ;;  %s3280_s18 = sshll.u32 %s3568_s16, 4  ;;  %s3281_s18 = int_to_ptr.vmem [resolvable:$false] %s3280_s18 }
  0x65   : > { %s3282_s3 = scalar_lea.vmem %s3281_s18, 1024  ;;  %p3283_p9 = scmp.lt.s32.totalorder %s496_s2, %s3281_s18 }
  0x66   : > { %p3278_p5 = pnand %p3276_p6, %p3722_p8  ;;  %p3284_p11 = scmp.lt.s32.totalorder %s3282_s3, %s3275_s25 }
  0x68   : > { %p3279_p13 = pneg %p3278_p5  ;;  %p3285_p3 = por %p3284_p11, %p3283_p9 }
  0x6a   : > { %p3286_p0 = pnand %p3285_p3, %p3279_p13 }
  0x6c   : > { %3289 = shalt.err (!%p3286_p0)
}
  0x6d   : > { %2891 = dma.hbm_to_vmem [thread:$0]  (!%p3707_p7), %s494_s12, 512, %s496_s2, %s3833_s1, %s3565_s10, %s3565_s10, %s3566_s4  }
  0x6e   : > { %s3569_s0 = smov [#allocation11]   ;;  %s517_s27 = scalar_lea.hbm %s4726_s7, %s3781_s19 }
  0x6f   : > { %s403_s29 = sshll.u32 %s3569_s0, 4  ;;  %s404_s29 = int_to_ptr.vmem [resolvable:$true] %s403_s29 }
  0x70   : > { %s3301_s3 = scalar_lea.vmem %s404_s29, 1024  ;;  %p3309_p9 = scmp.lt.s32.totalorder %s404_s29, %s404_s29 }
  0x71   : > { %p3302_p6 = scmp.ne.s32.totalorder %s404_s29, %s3301_s3  ;;  %p3310_p11 = scmp.lt.s32.totalorder %s3301_s3, %s3301_s3 }
  0x73   : > { %p3304_p5 = pnand %p3302_p6, %p3210_p4  ;;  %p3311_p3 = por %p3310_p11, %p3309_p9 }
  0x75   : > { %p3305_p13 = pneg %p3304_p5 }
  0x77   : > { %p3312_p0 = pnand %p3311_p3, %p3305_p13 }
  0x79   : > { %3315 = shalt.err (!%p3312_p0)
}
  0x7a   : > { %s4792_s5 = sld [smem:[#allocation44_spill]]  ;;  %s3329_s12 = scalar_lea.vmem %s3743_s9, 128 }
  0x7b   : > { %p3330_p4 = scmp.ne.s32.totalorder %s3743_s9, %s3329_s12  ;;  %s3570_s13 = smov [#allocation10]  }
  0x7c   : > { %s3334_s16 = sshll.u32 %s3570_s13, 4  ;;  %s3335_s16 = int_to_ptr.vmem [resolvable:$false] %s3334_s16 }
  0x7d   : > { %p3332_p6 = pnand %p3330_p4, %p3722_p8  ;;  %s3336_s20 = scalar_lea.vmem %s3335_s16, 256 }
  0x7e   : > { %p3337_p13 = scmp.lt.s32.totalorder %s3743_s9, %s3335_s16  ;;  %p3338_p9 = scmp.lt.s32.totalorder %s3336_s20, %s3329_s12 }
  0x7f   : > { %p3333_p5 = pneg %p3332_p6 }
  0x80   : > { %2878 = dma.hbm_to_vmem [thread:$0]  (!%p3786_p1), %s4792_s5, 1024, %s404_s29, [#allocation8], %s3565_s10, %s3565_s10, %s3566_s4  }
  0x81   : > { %p3339_p11 = por %p3338_p9, %p3337_p13 }
  0x83   : > { %p3340_p3 = pnand %p3339_p11, %p3333_p5 }
  0x85   : > { %3343 = shalt.err (!%p3340_p3)
}
  0x86   : > { %s4793_s18 = smov 4   ;;  %s4794_s0 = smov 64  }
  0x87   : > { %2888 = dma.hbm_to_vmem [thread:$0]  (!%p3707_p7), %s3739_s23, 128, %s3743_s9, %s3718_s30, %s4794_s0, %s4794_s0, %s4793_s18  }
  0x88   : > { %s509_s10 = scalar_lea.vmem [#allocation14], %s3714_s14  ;;  %s3571_s26 = smov [#allocation14]  }
  0x89   : > { %s518_s4 = sshll.u32 %s509_s10, 4  ;;  %s3362_s24 = sshll.u32 %s3571_s26, 4  ;;  %s519_s4 = int_to_ptr.vmem [resolvable:$true] %s518_s4  ;;  %s3363_s24 = int_to_ptr.vmem [resolvable:$false] %s3362_s24 }
  0x8a   : > { %s3357_s29 = scalar_lea.vmem %s519_s4, 512  ;;  %s3364_s3 = scalar_lea.vmem %s3363_s24, 1024 }
  0x8b   : > { %p3358_p1 = scmp.ne.s32.totalorder %s519_s4, %s3357_s29  ;;  %p3365_p6 = scmp.lt.s32.totalorder %s519_s4, %s3363_s24 }
  0x8c   : > { %p3366_p5 = scmp.lt.s32.totalorder %s3364_s3, %s3357_s29 }
  0x8d   : > { %p3360_p0 = pnand %p3358_p1, %p3722_p8 }
  0x8e   : > { %p3367_p13 = por %p3366_p5, %p3365_p6 }
  0x8f   : > { %p3361_p4 = pneg %p3360_p0 }
  0x91   : > { %p3368_p9 = pnand %p3367_p13, %p3361_p4 }
  0x93   : > { %3371 = shalt.err (!%p3368_p9)
}
  0x94   : > { %2894 = dma.hbm_to_vmem [thread:$0]  (!%p3707_p7), %s517_s27, 512, %s519_s4, %s3833_s1, %s4794_s0, %s4794_s0, %s4793_s18  }
  0x95   : > { %s540_s25 = scalar_lea.hbm %s4727_s8, %s3781_s19  ;;  %s532_s12 = scalar_lea.vmem [#allocation15], %s3714_s14 }
  0x96   : > { %s541_s13 = sshll.u32 %s532_s12, 4  ;;  %s529_s16 = scalar_lea.sflag [#allocation16], %s3695_s15  ;;  %s542_s13 = int_to_ptr.vmem [resolvable:$true] %s541_s13 }
  0x97   : > { %s3385_s20 = scalar_lea.vmem %s542_s13, 512  ;;  %s3572_s10 = smov [#allocation15]  }
  0x98   : > { %p3386_p11 = scmp.ne.s32.totalorder %s542_s13, %s3385_s20  ;;  %s3390_s29 = sshll.u32 %s3572_s10, 4  ;;  %s3391_s29 = int_to_ptr.vmem [resolvable:$false] %s3390_s29 }
  0x99   : > { %s3392_s26 = scalar_lea.vmem %s3391_s29, 1024  ;;  %p3393_p0 = scmp.lt.s32.totalorder %s542_s13, %s3391_s29 }
  0x9a   : > { %p3388_p3 = pnand %p3386_p11, %p3722_p8  ;;  %p3394_p4 = scmp.lt.s32.totalorder %s3392_s26, %s3385_s20 }
  0x9c   : > { %p3389_p1 = pneg %p3388_p3  ;;  %p3395_p6 = por %p3394_p4, %p3393_p0 }
  0x9e   : > { %p3396_p5 = pnand %p3395_p6, %p3389_p1 }
  0xa0   : > { %3399 = shalt.err (!%p3396_p5)
}
  0xa1   : > { %2897 = dma.hbm_to_vmem [thread:$0]  (!%p3707_p7), %s540_s25, 512, %s542_s13, %s529_s16, %s4794_s0, %s4794_s0, %s4793_s18  }
  0xa2   : > { %553 = sbr.rel (%p3774_p2) target bundleno = 1945 (0x799), region = 52  ;;  %s4795_s14 = sld [smem:[#allocation31_spill]] (!%p3774_p2) }
  0xa3   : > { %s3901_s17 = sand.u32 (!%p3774_p2), 1, %s3746_s11  }
  0xa4   : > { %s556_s27 = scalar_lea.sflag (!%p3774_p2), [#allocation5], %s3901_s17 }
  0xa8   : > { %s3904_s1 = sand.u32 1, %s4795_s14  }
  0xa9   : > { %s2574_s19 = sshll.u32 %s3904_s1, 3 }
  0xaa   : > { %s3908_s4 = scalar_lea.vmem [#allocation4], %s2574_s19 }
  0xab   : > { %3505 = dma.done.wait (%p3757_p10), %s556_s27, 128  }
  0xac   : > { %3507 = vsyncadd (%p3757_p10), %s556_s27, 4294967168  ;;  %p4797_p7 = scmp.eq.s32.totalorder %s3746_s11, 0 }
  0xae   : > { %3509 = dma.done.wait (%p4797_p7), [#allocation8], 1024   ;;  %p4798_p8 = pmov %p4797_p7 }
  0xaf   : > { %s3919_s22 = sshll.u32 %s3904_s1, 5 }
  0xb0   : > { %3511 = vsyncadd (%p4798_p8), [#allocation8], 4294966272  ;;  %s3922_s21 = scalar_lea.vmem [#allocation9], %s3919_s22 }
  0xb1   : > { %3513 = dma.done.wait (%p3757_p10), %s556_s27, 640  }
  0xb2   : > { %3515 = vsyncadd (%p3757_p10), %s556_s27, 4294966656  ;;  %s3928_s18 = scalar_lea.vmem [#allocation10], %s2574_s19  ;;  %p4799_p2 = pmov %p4797_p7 }
  0xb4   : > { %3517 = dma.done.wait (%p4799_p2), [#allocation8], 1024   ;;  %p4800_p13 = pmov %p4799_p2 }
  0xb5   : > { %s591_s0 = scalar_lea.sflag [#allocation13], %s3901_s17  ;;  %s3936_s24 = scalar_lea.vmem [#allocation12], %s3919_s22 }
  0xb6   : > { %3519 = vsyncadd (%p4800_p13), [#allocation8], 4294966272 }
  0xb7   : > { %3521 = dma.done.wait (%p3757_p10), %s591_s0, 1024  }
  0xb8   : > { %3523 = vsyncadd (%p3757_p10), %s591_s0, 4294966272  ;;  %s3943_s3 = scalar_lea.vmem [#allocation14], %s3919_s22  ;;  %s609_s9 = scalar_lea.sflag [#allocation16], %s3904_s1 }
  0xb9   : > { %s3947_s11 = scalar_lea.vmem [#allocation15], %s3919_s22 }
  0xba   : > { %3525 = dma.done.wait (%p3757_p10), %s609_s9, 512  }
  0xbb   : > { %3527 = vsyncadd (%p3757_p10), %s609_s9, 4294966784  ;;  %v3573_v0 = vmov 0   ;;  %v2974_v1 = vld [vmem:[#allocation7 + $0x24] ss:$16 sps:$4 sm:$0xff]   ;;  %v2976_v2 = vld [vmem:[#allocation7 + $0x20] ss:$16 sps:$4 sm:$0xff]  }
  0xbc   : > { %799 = vmatprep.mubr.bf16.mxu0 %v3573_v0  ;;  %842 = vmatprep.mubr.bf16.mxu1 %v3573_v0  ;;  %v2977_v3 = vld [vmem:[#allocation7 + $0x4] ss:$16 sps:$4 sm:$0xff]   ;;  %v2979_v4 = vld [vmem:[#allocation7] ss:$16 sps:$4 sm:$0xff]   ;;  %v2981_v6 = vld [vmem:[#allocation7 + $0x2c] ss:$16 sps:$4 sm:$0xff]  }
  0xbd   : > { %779 = vmatprep.subr.bf16.mxu0 %v2974_v1  ;;  %v2980_v5 = vld [vmem:[%s3908_s4] sm:$0xff]   ;;  %822 = vmatprep.subr.bf16.mxu1 %v2981_v6  ;;  %vm763_vm0 = vcmask 261120   ;;  %v2993_v14 = vld [vmem:[%s3928_s18] sm:$0xff]   ;;  %v3574_v16 = vmov 0.0   ;;  %vm3575_vm1 = vmmov 0   ;;  %vm1095_vm2 = vcmask 130048  }
  0xbe   : > { %780 = vmatpush1.bf16.msra.mxu0 %v2976_v2  ;;  %v2983_v7 = vld [vmem:[#allocation7 + $0x28] ss:$16 sps:$4 sm:$0xff]   ;;  %v2984_v8 = vld [vmem:[#allocation7 + $0xc] ss:$16 sps:$4 sm:$0xff]   ;;  %v2987_v10 = vld [vmem:[#allocation11 + $0x20] ss:$16 sps:$4 sm:$0xff]  }
  0xbf   : > { %781 = vmatprep.subr.bf16.mxu0 %v2977_v3  ;;  %v2986_v9 = vld [vmem:[#allocation7 + $0x8] ss:$16 sps:$4 sm:$0xff]   ;;  %823 = vmatpush1.bf16.msra.mxu1 %v2983_v7  ;;  %v2989_v11 = vld [vmem:[#allocation11 + $0x24] ss:$16 sps:$4 sm:$0xff]   ;;  %v2990_v13 = vld [vmem:[#allocation11] ss:$16 sps:$4 sm:$0xff]  }
  0xc0   : > { %824 = vmatprep.subr.bf16.mxu1 %v2984_v8  ;;  %v2992_v12 = vld [vmem:[#allocation11 + $0x4] ss:$16 sps:$4 sm:$0xff]   ;;  %v2994_v15 = vld [vmem:[%s3922_s21] ss:$16 sps:$4 sm:$0xff]   ;;  %v3000_v17 = vld [vmem:[#allocation11 + $0x28] ss:$16 sps:$4 sm:$0xff]  }
  0xc1   : > { %v3002_v18 = vld [vmem:[#allocation11 + $0x2c] ss:$16 sps:$4 sm:$0xff]   ;;  %v3003_v20 = vld [vmem:[#allocation11 + $0x8] ss:$16 sps:$4 sm:$0xff]   ;;  %v3006_v21 = vld [vmem:[%s3936_s24] ss:$16 sps:$4 sm:$0xff]  }
  0xc2   : > { %782 = vmatpush1.bf16.msra.mxu0 %v2979_v4  ;;  %v3005_v19 = vld [vmem:[#allocation11 + $0xc] ss:$16 sps:$4 sm:$0xff]   ;;  %v2996_v34 = vld [vmem:[%s3922_s21 + $0x4] ss:$16 sps:$4 sm:$0xff]   ;;  %v2997_v41 = vld [vmem:[%s3922_s21 + $0x8] ss:$16 sps:$4 sm:$0xff]  }
  0xc3   : > { %935 = vmatprep.subr.bf16.mxu0 %v2989_v11  ;;  %825 = vmatpush1.bf16.msra.mxu1 %v2986_v9  ;;  %v3008_v44 = vld [vmem:[%s3936_s24 + $0x4] ss:$16 sps:$4 sm:$0xff]   ;;  %v2999_v47 = vld [vmem:[%s3922_s21 + $0xc] ss:$16 sps:$4 sm:$0xff]   ;;  %v3009_v56 = vld [vmem:[%s3936_s24 + $0x8] ss:$16 sps:$4 sm:$0xff]  }
  0xc4   : > { %978 = vmatprep.subr.bf16.mxu1 %v3002_v18  ;;  %v3011_v63 = vld [vmem:[%s3936_s24 + $0xc] ss:$16 sps:$4 sm:$0xff]   ;;  %v3992_v4 = vld [vmem:[%s3943_s3] sm:$0xff]   ;;  %vm1092_vm3 = vcmask 125952   ;;  %s4008_s30 = scalar_lea.vmem [#allocation17], %s3919_s22  ;;  %s1188_s23 = sld [smem:[#allocation3]] }
  0xc5   : > { %2595 = vmatmul.mubr.msk.bf16.vlgmr.msra.gmra.mxu0 %vm763_vm0, %v2980_v5  ;;  %v2723_v8 = vunpack.c.h.bf16 %v3992_v4  ;;  %s2626_s2 = sld [smem:[#allocation3 + $0x1]]  ;;  %s4177_s12 = scalar_lea.vmem [#allocation18], %s3919_s22 }
  0xc6   : > { %936 = vmatpush1.bf16.msra.mxu0 %v2987_v10  ;;  %955 = vmatprep.mubr.bf16.mxu0 %v3573_v0  ;;  %v4001_v10 = vld [vmem:[%s3943_s3 + $0x8] sm:$0xff]   ;;  %s4173_s25 = sld [smem:[#allocation3 + $0x2]]  ;;  %s4367_s16 = scalar_lea.vmem [#allocation20], %s3919_s22 }
  0xc7   : > { %937 = vmatprep.subr.bf16.mxu0 %v2992_v12  ;;  %2596 = vmatmul.mubr.msk.bf16.vlgmr.msra.gmra.mxu1 %vm763_vm0, %v2980_v5  ;;  %v2722_v5 = vunpack.c.l.bf16 %v3992_v4  ;;  %s4221_s13 = sld [smem:[#allocation3 + $0x3]]  ;;  %s2209_s27 = sshll.u32 %s4177_s12, 4  ;;  %s4550_s27 = int_to_ptr.vmem [resolvable:$true] %s2209_s27 }
  0xc8   : > { %998 = vmatprep.mubr.bf16.mxu1 %v3573_v0  ;;  %979 = vmatpush1.bf16.msra.mxu1 %v3000_v17  ;;  %s4801_s20 = sld [smem:[#allocation33_spill]]  ;;  %s4753_s4 = scalar_lea.sflag [#allocation19], %s3901_s17 }
  0xc9   : > { %980 = vmatprep.subr.bf16.mxu1 %v3005_v19  ;;  %s4803_s15 = sld [smem:[#allocation46_spill]]  ;;  %s3400_s22 = scalar_lea.vmem %s4550_s27, 512 }
  0xca   : > { %938 = vmatpush1.bf16.msra.mxu0 %v2990_v13  ;;  %p3401_p10 = scmp.ne.s32.totalorder %s4550_s27, %s3400_s22  ;;  %s3576_s21 = smov [#allocation18]  }
  0xcb   : > { %2774 = vmatprep.subr.bf16.mxu0 %v3574_v16  ;;  %s3404_s18 = sshll.u32 %s3576_s21, 4  ;;  %s3405_s18 = int_to_ptr.vmem [resolvable:$false] %s3404_s18 }
  0xcc   : > { %981 = vmatpush1.bf16.msra.mxu1 %v3003_v20  ;;  %p3402_p9 = pnand %p3401_p10, %p3765_p12  ;;  %s3406_s0 = scalar_lea.vmem %s3405_s18, 1024 }
  0xcd   : > { %2606 = vmatmul.mubr.msk.bf16.vlgmr.msra.gmra.mxu0 %vm763_vm0, %v2993_v14  ;;  %2780 = vmatprep.subr.bf16.mxu1 %v3574_v16  ;;  %p3407_p3 = scmp.lt.s32.totalorder %s4550_s27, %s3405_s18  ;;  %p3408_p1 = scmp.lt.s32.totalorder %s3406_s0, %s3400_s22 }
  0xce   : > { %2775 = vmatpush3.bf16.xpose.msra.mxu0 %v2994_v15  ;;  %2776 = vmatprep.mubr.msk.bf16.mxu0 %vm3575_vm1, %v3574_v16  ;;  %v2730_v15 = vunpack.c.l.bf16 %v4001_v10  ;;  %s4541_s29 = sshll.u32 %s4801_s20, 9  ;;  %p3403_p11 = pneg %p3402_p9 }
  0xcf   : > { %2786 = vmatprep.subr.bf16.mxu0 %v3574_v16  ;;  %2607 = vmatmul.mubr.msk.bf16.vlgmr.msra.gmra.mxu1 %vm763_vm0, %v2993_v14  ;;  %s4547_s19 = scalar_lea.hbm %s4803_s15, %s4541_s29  ;;  %p3409_p0 = por %p3408_p1, %p3407_p3 }
  0xd0   : > { %2781 = vmatpush3.bf16.xpose.msra.mxu1 %v3006_v21  ;;  %2782 = vmatprep.mubr.msk.bf16.mxu1 %vm3575_vm1, %v3574_v16  ;;  %v2731_v21 = vunpack.c.h.bf16 %v4001_v10 }
  0xd1   : > { %2792 = vmatprep.subr.bf16.mxu1 %v3574_v16  ;;  %p3410_p4 = pnand %p3409_p0, %p3403_p11 }
 0x185   : > { %v801_v22 = vpop.f32.mrf.mxu0 }
 0x186   : > { %3012 = vtanh.f32 %v801_v22 }
 0x187   : > { %v803_v23 = vpop.f32.mrf.mxu0  ;;  %v844_v27 = vpop.f32.mrf.mxu1 }
 0x189   : > { %v805_v24 = vpop.f32.mrf.mxu0  ;;  %v846_v30 = vpop.f32.mrf.mxu1 }
 0x18a   : > { %3014 = vtanh.f32 %v805_v24 }
 0x18b   : > { %v807_v25 = vpop.f32.mrf.mxu0  ;;  %v848_v33 = vpop.f32.mrf.mxu1 }
 0x18c   : > { %3016 = vtanh.f32 %v807_v25 }
 0x18d   : > { %v957_v26 = vpop.f32.mrf.mxu0  ;;  %v850_v38 = vpop.f32.mrf.mxu1 }
 0x18e   : > { %3018 = vtanh.f32 %v957_v26 }
 0x18f   : > { %v959_v28 = vpop.f32.mrf.mxu0  ;;  %3020 = vtanh.f32 %v803_v23  ;;  %v1000_v57 = vpop.f32.mrf.mxu1  ;;  %v4027_v23 = vld [vmem:[%s3943_s3 + $0x10] sm:$0xff]  }
 0x191   : > { %v961_v29 = vpop.f32.mrf.mxu0  ;;  %v1002_v58 = vpop.f32.mrf.mxu1 }
 0x192   : > { %3022 = vtanh.f32 %v961_v29 }
 0x193   : > { %v3013_v31 = vpop.eup %3012  ;;  %3024 = vtanh.f32 %v844_v27  ;;  %v963_v52 = vpop.f32.mrf.mxu0 }
 0x194   : > { %3026 = vtanh.f32 %v848_v33  ;;  %v1004_v59 = vpop.f32.mrf.mxu1 }
 0x195   : > { %3028 = vtanh.f32 %v846_v30 }
 0x196   : > { %3030 = vtanh.f32 %v850_v38  ;;  %v1006_v60 = vpop.f32.mrf.mxu1 }
 0x197   : > { %v3015_v32 = vpop.eup %3014  ;;  %3032 = vtanh.f32 %v959_v28  ;;  %v2738_v28 = vunpack.c.l.bf16 %v4027_v23 }
 0x198   : > { %v861_v35 = vpack.c.bf16 %v3015_v32, %v3013_v31  ;;  %3034 = vtanh.f32 %v963_v52 }
 0x199   : > { %v3017_v36 = vpop.eup %3016  ;;  %3036 = vtanh.f32 %v1000_v57 }
 0x19a   : > { %2777 = vmatmul.mubr.bf16.vlgmr.msra.gmra.mxu0 %v861_v35  ;;  %3038 = vtanh.f32 %v1004_v59 }
 0x19b   : > { %2787 = vmatpush3.bf16.xpose.msra.mxu0 %v2996_v34  ;;  %2788 = vmatprep.mubr.msk.bf16.mxu0 %vm3575_vm1, %v3574_v16  ;;  %v3019_v37 = vpop.eup %3018  ;;  %3040 = vtanh.f32 %v1002_v58  ;;  %v2739_v34 = vunpack.c.h.bf16 %v4027_v23 }
 0x19c   : > { %2798 = vmatprep.subr.bf16.mxu0 %v3574_v16  ;;  %v3021_v39 = vpop.eup %3020  ;;  %3042 = vtanh.f32 %v1006_v60 }
 0x19d   : > { %v862_v42 = vpack.c.bf16 %v3017_v36, %v3021_v39  ;;  %v4048_v36 = vld [vmem:[%s3943_s3 + $0x18] sm:$0xff]  }
 0x19f   : > { %v3023_v40 = vpop.eup %3022 }
 0x1a0   : > { %v1017_v43 = vpack.c.bf16 %v3023_v40, %v3019_v37  ;;  %v3025_v45 = vpop.eup %3024 }
 0x1a1   : > { %v3027_v46 = vpop.eup %3026 }
 0x1a2   : > { %2789 = vmatmul.mubr.bf16.vlgmr.msra.gmra.mxu0 %v862_v42  ;;  %2783 = vmatmul.mubr.bf16.vlgmr.msra.gmra.mxu1 %v1017_v43  ;;  %v863_v48 = vpack.c.bf16 %v3027_v46, %v3025_v45  ;;  %v3029_v49 = vpop.eup %3028 }
 0x1a3   : > { %2799 = vmatpush3.bf16.xpose.msra.mxu0 %v2997_v41  ;;  %2800 = vmatprep.mubr.msk.bf16.mxu0 %vm3575_vm1, %v3574_v16  ;;  %v3031_v50 = vpop.eup %3030  ;;  %v2746_v41 = vunpack.c.l.bf16 %v4048_v36 }
 0x1a4   : > { %2810 = vmatprep.subr.bf16.mxu0 %v3574_v16  ;;  %2793 = vmatpush3.bf16.xpose.msra.mxu1 %v3008_v44  ;;  %v864_v51 = vpack.c.bf16 %v3031_v50, %v3029_v49  ;;  %v3033_v53 = vpop.eup %3032 }
 0x1a5   : > { %2794 = vmatprep.mubr.msk.bf16.mxu1 %vm3575_vm1, %v3574_v16  ;;  %2804 = vmatprep.subr.bf16.mxu1 %v3574_v16  ;;  %v3035_v54 = vpop.eup %3034 }
 0x1a6   : > { %v1018_v55 = vpack.c.bf16 %v3035_v54, %v3033_v53  ;;  %v3037_v61 = vpop.eup %3036 }
 0x1a7   : > { %v3039_v62 = vpop.eup %3038 }
 0x1a8   : > { %v1019_v0 = vpack.c.bf16 %v3039_v62, %v3037_v61  ;;  %v3041_v1 = vpop.eup %3040 }
 0x1a9   : > { %v3043_v2 = vpop.eup %3042 }
 0x1aa   : > { %2801 = vmatmul.mubr.bf16.vlgmr.msra.gmra.mxu0 %v863_v48  ;;  %v1020_v3 = vpack.c.bf16 %v3043_v2, %v3041_v1 }
 0x1ab   : > { %2811 = vmatpush3.bf16.xpose.msra.mxu0 %v2999_v47  ;;  %2812 = vmatprep.mubr.msk.bf16.mxu0 %vm3575_vm1, %v3574_v16  ;;  %v2747_v47 = vunpack.c.h.bf16 %v4048_v36 }
 0x1ac   : > { %2795 = vmatmul.mubr.bf16.vlgmr.msra.gmra.mxu1 %v1018_v55 }
 0x1ad   : > { %2806 = vmatprep.mubr.msk.bf16.mxu1 %vm3575_vm1, %v3574_v16  ;;  %2805 = vmatpush3.bf16.xpose.msra.mxu1 %v3009_v56 }
 0x1ae   : > { %2816 = vmatprep.subr.bf16.mxu1 %v3574_v16 }
 0x1b2   : > { %2813 = vmatmul.mubr.bf16.vlgmr.msra.gmra.mxu0 %v864_v51 }
 0x1b4   : > { %2807 = vmatmul.mubr.bf16.vlgmr.msra.gmra.mxu1 %v1019_v0 }
 0x1b5   : > { %2817 = vmatpush3.bf16.xpose.msra.mxu1 %v3011_v63  ;;  %2818 = vmatprep.mubr.msk.bf16.mxu1 %vm3575_vm1, %v3574_v16 }
 0x1bc   : > { %2819 = vmatmul.mubr.bf16.vlgmr.msra.gmra.mxu1 %v1020_v3 }
 0x25a   : > { %v1077_v6 = vpop.f32.mrf.mxu0 }
 0x25b   : > { %v3997_v7 = vadd.f32 %v2722_v5, %v1077_v6 }
 0x25c   : > { %v2778_v9 = vpop.f32.mrf.mxu0 }
 0x25d   : > { %v2693_v11 = vpack.c.bf16 %v3997_v7, %v3997_v7  ;;  %v1096_v12 = vsel %vm1095_vm2, %v3997_v7, -inf }
 0x25e   : > { %1097 = vmax.xlane.f32.xlu0 %v1096_v12  ;;  %v1080_v13 = vpop.f32.mrf.mxu0 }
 0x25f   : > { %1093 = vst.msk [vmem:[%s4008_s30] sm:$0xf] %vm1092_vm3, %v2693_v11  ;;  %v4014_v14 = vadd.f32 %v2723_v8, %v1080_v13 }
 0x260   : > { %v2779_v16 = vpop.f32.mrf.mxu0 }
 0x261   : > { %v2694_v17 = vpack.c.bf16 %v4014_v14, %v4014_v14  ;;  %v1099_v18 = vsel %vm1095_vm2, %v4014_v14, -inf }
 0x262   : > { %1100 = vmax.xlane.f32.xlu0 %v1099_v18  ;;  %v1354_v19 = vpop.f32.mrf.mxu0  ;;  %v1181_v56 = vpop.f32.mrf.mxu1 }
 0x263   : > { %1094 = vst.msk [vmem:[%s4008_s30 + $0x4] sm:$0xf] %vm1092_vm3, %v2694_v17  ;;  %v4023_v20 = vadd.f32 %v2730_v15, %v1354_v19  ;;  %v4072_v57 = vadd.f32 %v2722_v5, %v1181_v56 }
 0x264   : > { %v2790_v22 = vpop.f32.mrf.mxu0  ;;  %v2784_v58 = vpop.f32.mrf.mxu1 }
 0x265   : > { %v2699_v24 = vpack.c.bf16 %v4023_v20, %v4023_v20  ;;  %v1372_v25 = vsel %vm1095_vm2, %v4023_v20, -inf }
 0x266   : > { %1373 = vmax.xlane.f32.xlu1 %v1372_v25  ;;  %v1357_v26 = vpop.f32.mrf.mxu0  ;;  %v1184_v59 = vpop.f32.mrf.mxu1 }
 0x267   : > { %2623 = vst.msk [vmem:[%s4008_s30 + $0x8] sm:$0xf] %vm1092_vm3, %v2699_v24  ;;  %v4035_v27 = vadd.f32 %v2731_v21, %v1357_v26  ;;  %v4076_v60 = vadd.f32 %v2723_v8, %v1184_v59 }
 0x268   : > { %v2791_v29 = vpop.f32.mrf.mxu0  ;;  %v2785_v61 = vpop.f32.mrf.mxu1 }
 0x269   : > { %v2700_v30 = vpack.c.bf16 %v4035_v27, %v4035_v27  ;;  %v1375_v31 = vsel %vm1095_vm2, %v4035_v27, -inf }
 0x26a   : > { %1376 = vmax.xlane.f32.xlu1 %v1375_v31  ;;  %v1632_v32 = vpop.f32.mrf.mxu0 }
 0x26b   : > { %2624 = vst.msk [vmem:[%s4008_s30 + $0xc] sm:$0xf] %vm1092_vm3, %v2700_v30  ;;  %v1633_v33 = vadd.f32 %v2738_v28, %v1632_v32 }
 0x26c   : > { %v2802_v35 = vpop.f32.mrf.mxu0  ;;  %v1455_v62 = vpop.f32.mrf.mxu1 }
 0x26d   : > { %v2705_v37 = vpack.c.bf16 %v1633_v33, %v1633_v33  ;;  %v1650_v38 = vsel %vm1095_vm2, %v1633_v33, -inf  ;;  %v4078_v63 = vadd.f32 %v2730_v15, %v1455_v62 }
 0x26e   : > { %1651 = vmax.xlane.f32.xlu0 %v1650_v38  ;;  %v1635_v39 = vpop.f32.mrf.mxu0  ;;  %v2796_v0 = vpop.f32.mrf.mxu1 }
 0x26f   : > { %2643 = vst.msk [vmem:[%s4008_s30 + $0x10] sm:$0xf] %vm1092_vm3, %v2705_v37  ;;  %v1636_v40 = vadd.f32 %v2739_v34, %v1635_v39 }
 0x270   : > { %v2803_v42 = vpop.f32.mrf.mxu0  ;;  %v1458_v1 = vpop.f32.mrf.mxu1 }
 0x271   : > { %v2706_v43 = vpack.c.bf16 %v1636_v40, %v1636_v40  ;;  %v1653_v44 = vsel %vm1095_vm2, %v1636_v40, -inf  ;;  %v4080_v2 = vadd.f32 %v2731_v21, %v1458_v1 }
 0x272   : > { %1654 = vmax.xlane.f32.xlu1 %v1653_v44  ;;  %v1910_v45 = vpop.f32.mrf.mxu0  ;;  %v2797_v3 = vpop.f32.mrf.mxu1 }
 0x273   : > { %2644 = vst.msk [vmem:[%s4008_s30 + $0x14] sm:$0xf] %vm1092_vm3, %v2706_v43  ;;  %v1911_v46 = vadd.f32 %v2746_v41, %v1910_v45 }
 0x274   : > { %v2814_v48 = vpop.f32.mrf.mxu0 }
 0x275   : > { %v2711_v49 = vpack.c.bf16 %v1911_v46, %v1911_v46  ;;  %v1928_v50 = vsel %vm1095_vm2, %v1911_v46, -inf  ;;  %v4138_v48 = vpop.f32.mrf.mxu1 }
 0x276   : > { %1929 = vmax.xlane.f32.xlu0 %v1928_v50  ;;  %v1913_v51 = vpop.f32.mrf.mxu0 }
 0x277   : > { %2663 = vst.msk [vmem:[%s4008_s30 + $0x18] sm:$0xf] %vm1092_vm3, %v2711_v49  ;;  %v1914_v52 = vadd.f32 %v2747_v47, %v1913_v51  ;;  %v2808_v50 = vpop.f32.mrf.mxu1 }
 0x278   : > { %v2815_v53 = vpop.f32.mrf.mxu0 }
 0x279   : > { %v2712_v54 = vpack.c.bf16 %v1914_v52, %v1914_v52  ;;  %v1931_v55 = vsel %vm1095_vm2, %v1914_v52, -inf }
 0x27a   : > { %1932 = vmax.xlane.f32.xlu1 %v1931_v55 }
 0x27b   : > { %2664 = vst.msk [vmem:[%s4008_s30 + $0x1c] sm:$0xf] %vm1092_vm3, %v2712_v54 }
 0x2e7   : > { %v1098_v6 = vpop.xlane.xlu0 %1097 }
 0x2e8   : > { %v4083_v9 = vsub.f32 %v3997_v7, %v1098_v6 }
 0x2ea   : > { %v1104_v5 = vmul.f32 1.442695, %v4083_v9 }
 0x2eb   : > { %v1101_v10 = vpop.xlane.xlu0 %1100 }
 0x2ec   : > { %3044 = vpow2.f32 %v1104_v5  ;;  %v4087_v4 = vsub.f32 %v4014_v14, %v1101_v10  ;;  %v4150_v5 = vstv %s1188_s23 }
 0x2ee   : > { %v1106_v8 = vmul.f32 1.442695, %v4087_v4 }
 0x2ef   : > { %v1374_v11 = vpop.xlane.xlu1 %1373 }
 0x2f0   : > { %3046 = vpow2.f32 %v1106_v8  ;;  %v4091_v12 = vsub.f32 %v4023_v20, %v1374_v11  ;;  %v2725_v11 = vld [vmem:[%s3947_s11] sm:$0xff]  }
 0x2f2   : > { %v1380_v13 = vmul.f32 1.442695, %v4091_v12 }
 0x2f3   : > { %v1377_v15 = vpop.xlane.xlu1 %1376 }
 0x2f4   : > { %3048 = vpow2.f32 %v1380_v13  ;;  %v4095_v7 = vsub.f32 %v4035_v27, %v1377_v15 }
 0x2f6   : > { %v1382_v16 = vmul.f32 1.442695, %v4095_v7 }
 0x2f7   : > { %v1652_v17 = vpop.xlane.xlu0 %1651 }
 0x2f8   : > { %3050 = vpow2.f32 %v1382_v16  ;;  %v4098_v14 = vsub.f32 %v1633_v33, %v1652_v17 }
 0x2f9   : > { %v4100_v18 = vpop.eup %3044 }
 0x2fa   : > { %v1658_v19 = vmul.f32 1.442695, %v4098_v14  ;;  %v1108_v20 = vsel %vm1095_vm2, %v4100_v18, 0.0 }
 0x2fb   : > { %v1655_v21 = vpop.xlane.xlu1 %1654  ;;  %1109 = vadd.xlane.f32.xlu0 %v1108_v20  ;;  %v4156_v20 = vunpack.c.l.bf16 %v2725_v11 }
 0x2fc   : > { %3052 = vpow2.f32 %v1658_v19  ;;  %v4105_v22 = vsub.f32 %v1636_v40, %v1655_v21 }
 0x2fd   : > { %v4107_v24 = vpop.eup %3046 }
 0x2fe   : > { %v1660_v25 = vmul.f32 1.442695, %v4105_v22  ;;  %v1111_v26 = vsel %vm1095_vm2, %v4107_v24, 0.0 }
 0x2ff   : > { %v1930_v27 = vpop.xlane.xlu0 %1929  ;;  %1112 = vadd.xlane.f32.xlu1 %v1111_v26 }
 0x300   : > { %3054 = vpow2.f32 %v1660_v25  ;;  %v4112_v29 = vsub.f32 %v1911_v46, %v1930_v27  ;;  %v4162_v27 = vunpack.c.h.bf16 %v2725_v11 }
 0x301   : > { %v4114_v30 = vpop.eup %3048 }
 0x302   : > { %v1936_v31 = vmul.f32 1.442695, %v4112_v29  ;;  %v1384_v32 = vsel %vm1095_vm2, %v4114_v30, 0.0 }
 0x303   : > { %1385 = vadd.xlane.f32.xlu0 %v1384_v32  ;;  %v1933_v33 = vpop.xlane.xlu1 %1932 }
 0x304   : > { %3056 = vpow2.f32 %v1936_v31  ;;  %v4119_v35 = vsub.f32 %v1914_v52, %v1933_v33  ;;  %v4144_v52 = vpop.f32.mrf.mxu1 }
 0x305   : > { %v4121_v37 = vpop.eup %3050 }
 0x306   : > { %v1938_v38 = vmul.f32 1.442695, %v4119_v35  ;;  %v1387_v39 = vsel %vm1095_vm2, %v4121_v37, 0.0  ;;  %v2809_v53 = vpop.f32.mrf.mxu1 }
 0x307   : > { %1388 = vadd.xlane.f32.xlu1 %v1387_v39  ;;  %v2753_v39 = vld [vmem:[%s3947_s11 + $0x8] sm:$0xff]  }
 0x308   : > { %3058 = vpow2.f32 %v1938_v38  ;;  %v4146_v54 = vpop.f32.mrf.mxu1 }
 0x309   : > { %v4126_v40 = vpop.eup %3052 }
 0x30a   : > { %v1662_v42 = vsel %vm1095_vm2, %v4126_v40, 0.0  ;;  %v2820_v55 = vpop.f32.mrf.mxu1 }
 0x30b   : > { %1663 = vadd.xlane.f32.xlu0 %v1662_v42 }
 0x30c   : > { %v4148_v56 = vpop.f32.mrf.mxu1 }
 0x30d   : > { %v4130_v43 = vpop.eup %3054 }
 0x30e   : > { %v1665_v44 = vsel %vm1095_vm2, %v4130_v43, 0.0  ;;  %v2821_v58 = vpop.f32.mrf.mxu1 }
 0x30f   : > { %1666 = vadd.xlane.f32.xlu1 %v1665_v44  ;;  %v4188_v58 = vunpack.c.l.bf16 %v2753_v39 }
 0x311   : > { %v4134_v45 = vpop.eup %3056 }
 0x312   : > { %v1940_v46 = vsel %vm1095_vm2, %v4134_v45, 0.0 }
 0x313   : > { %1941 = vadd.xlane.f32.xlu0 %v1940_v46 }
 0x315   : > { %v4140_v49 = vpop.eup %3058 }
 0x316   : > { %v1943_v51 = vsel %vm1095_vm2, %v4140_v49, 0.0 }
 0x317   : > { %1944 = vadd.xlane.f32.xlu1 %v1943_v51 }
 0x384   : > { %v1110_v59 = vpop.xlane.xlu0 %1109 }
 0x385   : > { %3060 = vlog2.f32 %v1110_v59 }
 0x386   : > { %3062 = vrcp.f32 %v1110_v59 }
 0x388   : > { %v1113_v61 = vpop.xlane.xlu1 %1112 }
 0x389   : > { %3064 = vlog2.f32 %v1113_v61 }
 0x38a   : > { %3066 = vrcp.f32 %v1113_v61 }
 0x38c   : > { %v1386_v62 = vpop.xlane.xlu0 %1385 }
 0x38d   : > { %3068 = vlog2.f32 %v1386_v62 }
 0x38e   : > { %3070 = vrcp.f32 %v1386_v62 }
 0x390   : > { %v1389_v0 = vpop.xlane.xlu1 %1388 }
 0x391   : > { %3072 = vlog2.f32 %v1389_v0 }
 0x392   : > { %v3061_v1 = vpop.eup %3060  ;;  %3074 = vrcp.f32 %v1389_v0 }
 0x393   : > { %v3063_v3 = vpop.eup %3062  ;;  %v1115_v6 = vmul.f32 0.6931472, %v3061_v1 }
 0x394   : > { %v1664_v10 = vpop.xlane.xlu0 %1663  ;;  %v1138_v8 = vmul.f32 %v3063_v3, %v4100_v18 }
 0x395   : > { %3076 = vlog2.f32 %v1664_v10  ;;  %v1118_v13 = vsub.f32 %v4083_v9, %v1115_v6 }
 0x396   : > { %v3065_v15 = vpop.eup %3064  ;;  %3078 = vrcp.f32 %v1664_v10  ;;  %v1190_v16 = vmul.f32 %v4150_v5, %v1138_v8 }
 0x397   : > { %v3067_v17 = vpop.eup %3066  ;;  %v1117_v19 = vmul.f32 0.6931472, %v3065_v15  ;;  %v1120_v21 = vsub.f32 0.0, %v1118_v13 }
 0x398   : > { %v1667_v25 = vpop.xlane.xlu1 %1666  ;;  %v4159_v26 = vadd.f32 %v1190_v16, %v4072_v57  ;;  %v1139_v18 = vmul.f32 %v3067_v17, %v4107_v24  ;;  %v4171_v24 = vstv %s2626_s2  ;;  %v4209_v16 = vunpack.c.h.bf16 %v2753_v39 }
 0x399   : > { %3080 = vlog2.f32 %v1667_v25  ;;  %v1119_v9 = vsub.f32 %v4087_v4, %v1117_v19  ;;  %v1122_v4 = vmul.f32 %v4156_v20, %v1120_v21 }
 0x39a   : > { %v3069_v31 = vpop.eup %3068  ;;  %3082 = vrcp.f32 %v1667_v25  ;;  %v1204_v32 = vsel %vm1095_vm2, %v4159_v26, -inf  ;;  %v2695_v33 = vpack.c.bf16 %v4159_v26, %v4159_v26  ;;  %v1191_v38 = vmul.f32 %v4150_v5, %v1139_v18 }
 0x39b   : > { %v3071_v42 = vpop.eup %3070  ;;  %v1391_v44 = vmul.f32 0.6931472, %v3069_v31  ;;  %1205 = vmax.xlane.f32.xlu0 %v1204_v32  ;;  %v1121_v46 = vsub.f32 0.0, %v1119_v9  ;;  %v4219_v31 = vstv %s4173_s25  ;;  %v2755_v32 = vld [vmem:[%s3947_s11 + $0x10] sm:$0xff]  }
 0x39c   : > { %1202 = vst.msk [vmem:[%s4177_s12] sm:$0xf] %vm1092_vm3, %v2695_v33  ;;  %v4181_v50 = vpop.xlane.xlu0 %1941  ;;  %v4184_v51 = vadd.f32 %v1191_v38, %v4076_v60  ;;  %v1414_v53 = vmul.f32 %v3071_v42, %v4114_v30  ;;  %v1124_v30 = vsel %vm1095_vm2, %v1122_v4, 0.0  ;;  %v4234_v42 = vadd.f32 %v2738_v28, %v4138_v48 }
 0x39d   : > { %v1123_v55 = vmul.f32 %v4162_v27, %v1121_v46  ;;  %v1394_v59 = vsub.f32 %v4091_v12, %v1391_v44  ;;  %3084 = vrcp.f32 %v4181_v50 }
 0x39e   : > { %v3073_v61 = vpop.eup %3072  ;;  %v1207_v62 = vsel %vm1095_vm2, %v4184_v51, -inf  ;;  %v2696_v0 = vpack.c.bf16 %v4184_v51, %v4184_v51  ;;  %v1464_v1 = vmul.f32 %v4171_v24, %v1414_v53 }
 0x39f   : > { %v3075_v3 = vpop.eup %3074  ;;  %v1393_v6 = vmul.f32 0.6931472, %v3073_v61  ;;  %1208 = vmax.xlane.f32.xlu1 %v1207_v62  ;;  %v1125_v10 = vsel %vm1095_vm2, %v1123_v55, 0.0  ;;  %v1396_v8 = vsub.f32 0.0, %v1394_v59  ;;  %v4243_v61 = vunpack.c.l.bf16 %v2755_v32 }
 0x3a0   : > { %1203 = vst.msk [vmem:[%s4177_s12 + $0x4] sm:$0xf] %vm1092_vm3, %v2696_v0  ;;  %v4201_v12 = vpop.xlane.xlu1 %1944  ;;  %v4204_v11 = vadd.f32 %v1464_v1, %v4078_v63  ;;  %v1415_v13 = vmul.f32 %v3075_v3, %v4121_v37  ;;  %v4207_v15 = vadd.f32 %v1125_v10, %v1124_v30  ;;  %v4259_v10 = vadd.f32 %v2739_v34, %v4144_v52 }
 0x3a1   : > { %v1395_v17 = vsub.f32 %v4095_v7, %v1393_v6  ;;  %3086 = vrcp.f32 %v4201_v12  ;;  %v1398_v33 = vmul.f32 %v4188_v58, %v1396_v8  ;;  %v4253_v6 = vunpack.c.h.bf16 %v2755_v32 }
 0x3a2   : > { %v3077_v19 = vpop.eup %3076  ;;  %v1479_v21 = vsel %vm1095_vm2, %v4204_v11, -inf  ;;  %v2701_v25 = vpack.c.bf16 %v4204_v11, %v4204_v11  ;;  %v1465_v18 = vmul.f32 %v4171_v24, %v1415_v13  ;;  %v4275_v52 = vadd.f32 %v2746_v41, %v4146_v54 }
 0x3a3   : > { %v3079_v9 = vpop.eup %3078  ;;  %v1669_v37 = vmul.f32 0.6931472, %v3077_v19  ;;  %1480 = vmax.xlane.f32.xlu0 %v1479_v21  ;;  %v1397_v7 = vsub.f32 0.0, %v1395_v17 }
 0x3a4   : > { %2629 = vst.msk [vmem:[%s4177_s12 + $0x8] sm:$0xf] %vm1092_vm3, %v2701_v25  ;;  %v4228_v38 = vadd.f32 %v1465_v18, %v4080_v2  ;;  %v1692_v39 = vmul.f32 %v3079_v9, %v4126_v40 }
 0x3a5   : > { %v1672_v44 = vsub.f32 %v4098_v14, %v1669_v37  ;;  %v1399_v46 = vmul.f32 %v4209_v16, %v1397_v7  ;;  %v1400_v14 = vsel %vm1095_vm2, %v1398_v33, 0.0 }
 0x3a6   : > { %v3081_v4 = vpop.eup %3080  ;;  %v1482_v53 = vsel %vm1095_vm2, %v4228_v38, -inf  ;;  %v2702_v55 = vpack.c.bf16 %v4228_v38, %v4228_v38  ;;  %v1744_v59 = vmul.f32 %v4219_v31, %v1692_v39  ;;  %v4290_v39 = vadd.f32 %v2747_v47, %v4148_v56 }
 0x3a7   : > { %v3083_v40 = vpop.eup %3082  ;;  %v1671_v62 = vmul.f32 0.6931472, %v3081_v4  ;;  %1483 = vmax.xlane.f32.xlu1 %v1482_v53  ;;  %v1674_v28 = vsub.f32 0.0, %v1672_v44  ;;  %v1401_v48 = vsel %vm1095_vm2, %v1399_v46, 0.0 }
 0x3a8   : > { %2630 = vst.msk [vmem:[%s4177_s12 + $0xc] sm:$0xf] %vm1092_vm3, %v2702_v55  ;;  %v1746_v0 = vadd.f32 %v1744_v59, %v4234_v42  ;;  %v1693_v1 = vmul.f32 %v3083_v40, %v4130_v43  ;;  %v4251_v3 = vadd.f32 %v1401_v48, %v1400_v14  ;;  %v4264_v43 = vstv %s4221_s13 }
 0x3a9   : > { %v1673_v30 = vsub.f32 %v4105_v22, %v1671_v62  ;;  %v1676_v25 = vmul.f32 %v4243_v61, %v1674_v28 }
 0x3aa   : > { %v1759_v8 = vsel %vm1095_vm2, %v1746_v0, -inf  ;;  %v2707_v13 = vpack.c.bf16 %v1746_v0, %v1746_v0  ;;  %v1745_v17 = vmul.f32 %v4219_v31, %v1693_v1  ;;  %v3085_v19 = vpop.eup %3084 }
 0x3ab   : > { %1760 = vmax.xlane.f32.xlu0 %v1759_v8  ;;  %v1675_v21 = vsub.f32 0.0, %v1673_v30  ;;  %v1970_v23 = vmul.f32 %v3085_v19, %v4134_v45  ;;  %v1678_v7 = vsel %vm1095_vm2, %v1676_v25, 0.0 }
 0x3ac   : > { %2649 = vst.msk [vmem:[%s4177_s12 + $0x10] sm:$0xf] %vm1092_vm3, %v2707_v13  ;;  %v1747_v22 = vadd.f32 %v1745_v17, %v4259_v10 }
 0x3ad   : > { %v1677_v34 = vmul.f32 %v4253_v6, %v1675_v21  ;;  %v2020_v37 = vmul.f32 %v4264_v43, %v1970_v23 }
 0x3ae   : > { %v1762_v18 = vsel %vm1095_vm2, %v1747_v22, -inf  ;;  %v2708_v9 = vpack.c.bf16 %v1747_v22, %v1747_v22  ;;  %v3087_v32 = vpop.eup %3086 }
 0x3af   : > { %1763 = vmax.xlane.f32.xlu1 %v1762_v18  ;;  %v1679_v45 = vsel %vm1095_vm2, %v1677_v34, 0.0  ;;  %v2022_v33 = vadd.f32 %v2020_v37, %v4275_v52  ;;  %v1971_v41 = vmul.f32 %v3087_v32, %v4140_v49 }
 0x3b0   : > { %2650 = vst.msk [vmem:[%s4177_s12 + $0x14] sm:$0xf] %vm1092_vm3, %v2708_v9  ;;  %v4285_v54 = vadd.f32 %v1679_v45, %v1678_v7 }
 0x3b1   : > { %v2035_v44 = vsel %vm1095_vm2, %v2022_v33, -inf  ;;  %v2713_v46 = vpack.c.bf16 %v2022_v33, %v2022_v33  ;;  %v2021_v4 = vmul.f32 %v4264_v43, %v1971_v41 }
 0x3b2   : > { %2036 = vmax.xlane.f32.xlu0 %v2035_v44 }
 0x3b3   : > { %2669 = vst.msk [vmem:[%s4177_s12 + $0x18] sm:$0xf] %vm1092_vm3, %v2713_v46  ;;  %v2023_v53 = vadd.f32 %v2021_v4, %v4290_v39 }
 0x3b5   : > { %v2038_v55 = vsel %vm1095_vm2, %v2023_v53, -inf  ;;  %v2714_v49 = vpack.c.bf16 %v2023_v53, %v2023_v53 }
 0x3b6   : > { %2039 = vmax.xlane.f32.xlu1 %v2038_v55 }
 0x3b7   : > { %2670 = vst.msk [vmem:[%s4177_s12 + $0x1c] sm:$0xf] %vm1092_vm3, %v2714_v49 }
 0x424   : > { %v1206_v59 = vpop.xlane.xlu0 %1205 }
 0x425   : > { %v4301_v36 = vsub.f32 %v4159_v26, %v1206_v59 }
 0x427   : > { %v1212_v47 = vmul.f32 1.442695, %v4301_v36 }
 0x428   : > { %v1209_v56 = vpop.xlane.xlu1 %1208 }
 0x429   : > { %3088 = vpow2.f32 %v1212_v47  ;;  %v4305_v40 = vsub.f32 %v4184_v51, %v1209_v56 }
 0x42b   : > { %v1214_v62 = vmul.f32 1.442695, %v4305_v40 }
 0x42c   : > { %v1481_v28 = vpop.xlane.xlu0 %1480 }
 0x42d   : > { %3090 = vpow2.f32 %v1214_v62  ;;  %v4309_v14 = vsub.f32 %v4204_v11, %v1481_v28 }
 0x42f   : > { %v1487_v48 = vmul.f32 1.442695, %v4309_v14 }
 0x430   : > { %v1484_v1 = vpop.xlane.xlu1 %1483 }
 0x431   : > { %3092 = vpow2.f32 %v1487_v48  ;;  %v4313_v26 = vsub.f32 %v4228_v38, %v1484_v1 }
 0x433   : > { %v1489_v30 = vmul.f32 1.442695, %v4313_v26 }
 0x434   : > { %v1761_v8 = vpop.xlane.xlu0 %1760 }
 0x435   : > { %3094 = vpow2.f32 %v1489_v30  ;;  %v4316_v51 = vsub.f32 %v1746_v0, %v1761_v8 }
 0x436   : > { %v3089_v13 = vpop.eup %3088 }
 0x437   : > { %v1767_v17 = vmul.f32 1.442695, %v4316_v51  ;;  %v1216_v19 = vsel %vm1095_vm2, %v3089_v13, 0.0 }
 0x438   : > { %1217 = vadd.xlane.f32.xlu0 %v1216_v19  ;;  %v1764_v11 = vpop.xlane.xlu1 %1763 }
 0x439   : > { %3096 = vpow2.f32 %v1767_v17  ;;  %v4320_v21 = vsub.f32 %v1747_v22, %v1764_v11 }
 0x43a   : > { %v3091_v25 = vpop.eup %3090 }
 0x43b   : > { %v1769_v38 = vmul.f32 1.442695, %v4320_v21  ;;  %v1219_v23 = vsel %vm1095_vm2, %v3091_v25, 0.0  ;;  %v2037_v34 = vpop.xlane.xlu0 %2036 }
 0x43c   : > { %1220 = vadd.xlane.f32.xlu1 %v1219_v23  ;;  %v4324_v0 = vsub.f32 %v2022_v33, %v2037_v34 }
 0x43d   : > { %3098 = vpow2.f32 %v1769_v38 }
 0x43e   : > { %v4326_v18 = vpop.eup %3092  ;;  %v2043_v9 = vmul.f32 1.442695, %v4324_v0 }
 0x43f   : > { %v1491_v37 = vsel %vm1095_vm2, %v4326_v18, 0.0  ;;  %v2040_v22 = vpop.xlane.xlu1 %2039 }
 0x440   : > { %1492 = vadd.xlane.f32.xlu0 %v1491_v37  ;;  %3100 = vpow2.f32 %v2043_v9  ;;  %v4331_v32 = vsub.f32 %v2023_v53, %v2040_v22 }
 0x442   : > { %v4333_v7 = vpop.eup %3094  ;;  %v2045_v45 = vmul.f32 1.442695, %v4331_v32 }
 0x443   : > { %v1494_v33 = vsel %vm1095_vm2, %v4333_v7, 0.0 }
 0x444   : > { %1495 = vadd.xlane.f32.xlu1 %v1494_v33  ;;  %3102 = vpow2.f32 %v2045_v45 }
 0x446   : > { %v4338_v41 = vpop.eup %3096 }
 0x447   : > { %v1771_v44 = vsel %vm1095_vm2, %v4338_v41, 0.0 }
 0x448   : > { %1772 = vadd.xlane.f32.xlu0 %v1771_v44 }
 0x44a   : > { %v4342_v46 = vpop.eup %3098 }
 0x44b   : > { %v1774_v4 = vsel %vm1095_vm2, %v4342_v46, 0.0 }
 0x44c   : > { %1775 = vadd.xlane.f32.xlu1 %v1774_v4 }
 0x44d   : > { %v4346_v53 = vpop.eup %3100 }
 0x44e   : > { %v2047_v55 = vsel %vm1095_vm2, %v4346_v53, 0.0 }
 0x44f   : > { %2048 = vadd.xlane.f32.xlu0 %v2047_v55 }
 0x451   : > { %v4350_v49 = vpop.eup %3102 }
 0x452   : > { %v2050_v59 = vsel %vm1095_vm2, %v4350_v49, 0.0 }
 0x453   : > { %2051 = vadd.xlane.f32.xlu1 %v2050_v59 }
 0x4c1   : > { %v1218_v47 = vpop.xlane.xlu0 %1217 }
 0x4c2   : > { %3104 = vlog2.f32 %v1218_v47 }
 0x4c3   : > { %3106 = vrcp.f32 %v1218_v47 }
 0x4c5   : > { %v1221_v56 = vpop.xlane.xlu1 %1220 }
 0x4c6   : > { %3108 = vlog2.f32 %v1221_v56 }
 0x4c7   : > { %3110 = vrcp.f32 %v1221_v56 }
 0x4c9   : > { %v1493_v62 = vpop.xlane.xlu0 %1492 }
 0x4ca   : > { %3112 = vlog2.f32 %v1493_v62 }
 0x4cb   : > { %3114 = vrcp.f32 %v1493_v62 }
 0x4cd   : > { %v1496_v28 = vpop.xlane.xlu1 %1495 }
 0x4ce   : > { %3116 = vlog2.f32 %v1496_v28 }
 0x4cf   : > { %v3105_v48 = vpop.eup %3104  ;;  %3118 = vrcp.f32 %v1496_v28 }
 0x4d0   : > { %v3107_v1 = vpop.eup %3106  ;;  %v1223_v30 = vmul.f32 0.6931472, %v3105_v48 }
 0x4d1   : > { %v1773_v8 = vpop.xlane.xlu0 %1772  ;;  %v1246_v17 = vmul.f32 %v3107_v1, %v3089_v13 }
 0x4d2   : > { %3120 = vlog2.f32 %v1773_v8  ;;  %v1226_v19 = vsub.f32 %v4301_v36, %v1223_v30 }
 0x4d3   : > { %v3109_v11 = vpop.eup %3108  ;;  %3122 = vrcp.f32 %v1773_v8  ;;  %v1251_v38 = vmul.f32 %v1246_v17, %v4150_v5 }
 0x4d4   : > { %v3111_v23 = vpop.eup %3110  ;;  %v1225_v34 = vmul.f32 0.6931472, %v3109_v11  ;;  %v1228_v9 = vsub.f32 0.0, %v1226_v19 }
 0x4d5   : > { %v1776_v37 = vpop.xlane.xlu1 %1775  ;;  %v4357_v22 = vadd.f32 %v1251_v38, %v4072_v57  ;;  %v1247_v45 = vmul.f32 %v3111_v23, %v3091_v25 }
 0x4d6   : > { %3124 = vlog2.f32 %v1776_v37  ;;  %v1227_v33 = vsub.f32 %v4305_v40, %v1225_v34  ;;  %v1230_v57 = vmul.f32 %v4156_v20, %v1228_v9 }
 0x4d7   : > { %v3113_v13 = vpop.eup %3112  ;;  %3126 = vrcp.f32 %v1776_v37  ;;  %v1265_v36 = vsel %vm1095_vm2, %v4357_v22, -inf  ;;  %v2697_v44 = vpack.c.bf16 %v4357_v22, %v4357_v22  ;;  %v1252_v4 = vmul.f32 %v1247_v45, %v4150_v5 }
 0x4d8   : > { %v3115_v55 = vpop.eup %3114  ;;  %v1498_v59 = vmul.f32 0.6931472, %v3113_v13  ;;  %1266 = vmax.xlane.f32.xlu0 %v1265_v36  ;;  %v1229_v47 = vsub.f32 0.0, %v1227_v33  ;;  %v4371_v40 = vpop.xlane.xlu0 %2048 }
 0x4d9   : > { %1263 = vst.msk [vmem:[%s4367_s16] sm:$0xf] %vm1092_vm3, %v2697_v44  ;;  %v4374_v25 = vadd.f32 %v1252_v4, %v4076_v60  ;;  %v1521_v56 = vmul.f32 %v3115_v55, %v4326_v18  ;;  %3128 = vrcp.f32 %v4371_v40  ;;  %v1232_v18 = vsel %vm1095_vm2, %v1230_v57, 0.0 }
 0x4da   : > { %v1501_v5 = vsub.f32 %v4309_v14, %v1498_v59  ;;  %v1231_v62 = vmul.f32 %v4162_v27, %v1229_v47 }
 0x4db   : > { %v3117_v28 = vpop.eup %3116  ;;  %v1268_v48 = vsel %vm1095_vm2, %v4374_v25, -inf  ;;  %v2698_v1 = vpack.c.bf16 %v4374_v25, %v4374_v25  ;;  %v1526_v30 = vmul.f32 %v1521_v56, %v4171_v24 }
 0x4dc   : > { %v3119_v8 = vpop.eup %3118  ;;  %v1500_v60 = vmul.f32 0.6931472, %v3117_v28  ;;  %1269 = vmax.xlane.f32.xlu1 %v1268_v48  ;;  %v1503_v17 = vsub.f32 0.0, %v1501_v5  ;;  %v1233_v14 = vsel %vm1095_vm2, %v1231_v62, 0.0  ;;  %v4389_v19 = vpop.xlane.xlu1 %2051 }
 0x4dd   : > { %1264 = vst.msk [vmem:[%s4367_s16 + $0x4] sm:$0xf] %vm1092_vm3, %v2698_v1  ;;  %v4392_v11 = vadd.f32 %v1526_v30, %v4078_v63  ;;  %v1522_v38 = vmul.f32 %v3119_v8, %v4333_v7  ;;  %v4395_v23 = vadd.f32 %v1233_v14, %v1232_v18  ;;  %3130 = vrcp.f32 %v4389_v19 }
 0x4de   : > { %v1502_v34 = vsub.f32 %v4313_v26, %v1500_v60  ;;  %v1505_v7 = vmul.f32 %v4188_v58, %v1503_v17 }
 0x4df   : > { %v3121_v9 = vpop.eup %3120  ;;  %v1541_v37 = vsel %vm1095_vm2, %v4392_v11, -inf  ;;  %v2703_v45 = vpack.c.bf16 %v4392_v11, %v4392_v11  ;;  %v1527_v33 = vmul.f32 %v1522_v38, %v4171_v24 }
 0x4e0   : > { %v3123_v13 = vpop.eup %3122  ;;  %v1778_v63 = vmul.f32 0.6931472, %v3121_v9  ;;  %1542 = vmax.xlane.f32.xlu0 %v1541_v37  ;;  %v1504_v36 = vsub.f32 0.0, %v1502_v34 }
 0x4e1   : > { %2634 = vst.msk [vmem:[%s4367_s16 + $0x8] sm:$0xf] %vm1092_vm3, %v2703_v45  ;;  %v4408_v26 = vadd.f32 %v1527_v33, %v4080_v2  ;;  %v1801_v44 = vmul.f32 %v3123_v13, %v4338_v41  ;;  %v1507_v2 = vsel %vm1095_vm2, %v1505_v7, 0.0 }
 0x4e2   : > { %v1506_v4 = vmul.f32 %v4209_v16, %v1504_v36  ;;  %v1781_v55 = vsub.f32 %v4316_v51, %v1778_v63 }
 0x4e3   : > { %v3125_v59 = vpop.eup %3124  ;;  %v1544_v24 = vsel %vm1095_vm2, %v4408_v26, -inf  ;;  %v2704_v47 = vpack.c.bf16 %v4408_v26, %v4408_v26  ;;  %v1806_v57 = vmul.f32 %v1801_v44, %v4219_v31 }
 0x4e4   : > { %v3127_v56 = vpop.eup %3126  ;;  %v1780_v5 = vmul.f32 0.6931472, %v3125_v59  ;;  %1545 = vmax.xlane.f32.xlu1 %v1544_v24  ;;  %v1508_v41 = vsel %vm1095_vm2, %v1506_v4, 0.0  ;;  %v1783_v62 = vsub.f32 0.0, %v1781_v55 }
 0x4e5   : > { %2635 = vst.msk [vmem:[%s4367_s16 + $0xc] sm:$0xf] %vm1092_vm3, %v2704_v47  ;;  %v1808_v51 = vadd.f32 %v1806_v57, %v4234_v42  ;;  %v1802_v28 = vmul.f32 %v3127_v56, %v4342_v46  ;;  %v4424_v48 = vadd.f32 %v1508_v41, %v1507_v2 }
 0x4e6   : > { %v1782_v1 = vsub.f32 %v4320_v21, %v1780_v5  ;;  %v3129_v17 = vpop.eup %3128  ;;  %v1785_v14 = vmul.f32 %v4243_v61, %v1783_v62 }
 0x4e7   : > { %v1821_v30 = vsel %vm1095_vm2, %v1808_v51, -inf  ;;  %v2709_v8 = vpack.c.bf16 %v1808_v51, %v1808_v51  ;;  %v1807_v60 = vmul.f32 %v1802_v28, %v4219_v31  ;;  %v2077_v46 = vmul.f32 %v3129_v17, %v4346_v53 }
 0x4e8   : > { %1822 = vmax.xlane.f32.xlu0 %v1821_v30  ;;  %v1784_v18 = vsub.f32 0.0, %v1782_v1  ;;  %v1787_v37 = vsel %vm1095_vm2, %v1785_v14, 0.0 }
 0x4e9   : > { %2654 = vst.msk [vmem:[%s4367_s16 + $0x10] sm:$0xf] %vm1092_vm3, %v2709_v8  ;;  %v1809_v42 = vadd.f32 %v1807_v60, %v4259_v10  ;;  %v2082_v31 = vmul.f32 %v2077_v46, %v4264_v43 }
 0x4ea   : > { %v1786_v38 = vmul.f32 %v4253_v6, %v1784_v18  ;;  %v3131_v9 = vpop.eup %3130 }
 0x4eb   : > { %v1824_v21 = vsel %vm1095_vm2, %v1809_v42, -inf  ;;  %v2710_v34 = vpack.c.bf16 %v1809_v42, %v1809_v42  ;;  %v2084_v10 = vadd.f32 %v2082_v31, %v4275_v52  ;;  %v2078_v53 = vmul.f32 %v3131_v9, %v4350_v49 }
 0x4ec   : > { %1825 = vmax.xlane.f32.xlu1 %v1824_v21  ;;  %v1788_v45 = vsel %vm1095_vm2, %v1786_v38, 0.0 }
 0x4ed   : > { %2655 = vst.msk [vmem:[%s4367_s16 + $0x14] sm:$0xf] %vm1092_vm3, %v2710_v34  ;;  %v4443_v33 = vadd.f32 %v1788_v45, %v1787_v37  ;;  %v2097_v13 = vsel %vm1095_vm2, %v2084_v10, -inf  ;;  %v2715_v63 = vpack.c.bf16 %v2084_v10, %v2084_v10  ;;  %v2083_v36 = vmul.f32 %v2078_v53, %v4264_v43 }
 0x4ee   : > { %2098 = vmax.xlane.f32.xlu0 %v2097_v13 }
 0x4ef   : > { %2674 = vst.msk [vmem:[%s4367_s16 + $0x18] sm:$0xf] %vm1092_vm3, %v2715_v63  ;;  %v2085_v7 = vadd.f32 %v2083_v36, %v4290_v39 }
 0x4f1   : > { %v2100_v44 = vsel %vm1095_vm2, %v2085_v7, -inf  ;;  %v2716_v4 = vpack.c.bf16 %v2085_v7, %v2085_v7 }
 0x4f2   : > { %2101 = vmax.xlane.f32.xlu1 %v2100_v44 }
 0x4f3   : > { %2675 = vst.msk [vmem:[%s4367_s16 + $0x1c] sm:$0xf] %vm1092_vm3, %v2716_v4 }
 0x561   : > { %v1267_v52 = vpop.xlane.xlu0 %1266 }
 0x562   : > { %v4454_v49 = vsub.f32 %v4357_v22, %v1267_v52  ;;  %v2757_v52 = vld [vmem:[%s3947_s11 + $0x18] sm:$0xff]  }
 0x564   : > { %v1273_v55 = vmul.f32 1.442695, %v4454_v49 }
 0x565   : > { %v1270_v59 = vpop.xlane.xlu1 %1269 }
 0x566   : > { %3132 = vpow2.f32 %v1273_v55  ;;  %v4458_v43 = vsub.f32 %v4374_v25, %v1270_v59  ;;  %v4495_v55 = vunpack.c.h.bf16 %v2757_v52 }
 0x568   : > { %v1275_v24 = vmul.f32 1.442695, %v4458_v43 }
 0x569   : > { %v1543_v39 = vpop.xlane.xlu0 %1542 }
 0x56a   : > { %3134 = vpow2.f32 %v1275_v24  ;;  %v4462_v47 = vsub.f32 %v4392_v11, %v1543_v39  ;;  %v4499_v24 = vunpack.c.l.bf16 %v2757_v52 }
 0x56c   : > { %v1549_v57 = vmul.f32 1.442695, %v4462_v47 }
 0x56d   : > { %v1546_v56 = vpop.xlane.xlu1 %1545 }
 0x56e   : > { %3136 = vpow2.f32 %v1549_v57  ;;  %v4466_v22 = vsub.f32 %v4408_v26, %v1546_v56 }
 0x570   : > { %v1551_v5 = vmul.f32 1.442695, %v4466_v22 }
 0x571   : > { %v1823_v2 = vpop.xlane.xlu0 %1822 }
 0x572   : > { %3138 = vpow2.f32 %v1551_v5  ;;  %v4469_v25 = vsub.f32 %v1808_v51, %v1823_v2 }
 0x573   : > { %v3133_v41 = vpop.eup %3132 }
 0x574   : > { %v1829_v62 = vmul.f32 1.442695, %v4469_v25  ;;  %v1277_v28 = vsel %vm1095_vm2, %v3133_v41, 0.0 }
 0x575   : > { %1278 = vadd.xlane.f32.xlu0 %v1277_v28  ;;  %v1826_v11 = vpop.xlane.xlu1 %1825 }
 0x576   : > { %3140 = vpow2.f32 %v1829_v62  ;;  %v4473_v1 = vsub.f32 %v1809_v42, %v1826_v11 }
 0x577   : > { %v3135_v30 = vpop.eup %3134  ;;  %v2099_v60 = vpop.xlane.xlu0 %2098 }
 0x578   : > { %v1831_v26 = vmul.f32 1.442695, %v4473_v1  ;;  %v1280_v8 = vsel %vm1095_vm2, %v3135_v30, 0.0  ;;  %v4477_v51 = vsub.f32 %v2084_v10, %v2099_v60 }
 0x579   : > { %1281 = vadd.xlane.f32.xlu1 %v1280_v8 }
 0x57a   : > { %3142 = vpow2.f32 %v1831_v26  ;;  %v2105_v18 = vmul.f32 1.442695, %v4477_v51 }
 0x57b   : > { %v3137_v17 = vpop.eup %3136  ;;  %3144 = vlog2.f32 %v4201_v12  ;;  %v2102_v42 = vpop.xlane.xlu1 %2101 }
 0x57c   : > { %v1553_v14 = vsel %vm1095_vm2, %v3137_v17, 0.0  ;;  %3146 = vlog2.f32 %v4181_v50  ;;  %v4483_v46 = vsub.f32 %v2085_v7, %v2102_v42 }
 0x57d   : > { %1554 = vadd.xlane.f32.xlu0 %v1553_v14  ;;  %3148 = vpow2.f32 %v2105_v18 }
 0x57e   : > { %v2107_v21 = vmul.f32 1.442695, %v4483_v46 }
 0x57f   : > { %v3139_v38 = vpop.eup %3138 }
 0x580   : > { %v1556_v34 = vsel %vm1095_vm2, %v3139_v38, 0.0  ;;  %3150 = vpow2.f32 %v2107_v21 }
 0x581   : > { %1557 = vadd.xlane.f32.xlu1 %v1556_v34 }
 0x583   : > { %v3141_v31 = vpop.eup %3140 }
 0x584   : > { %v1833_v12 = vsel %vm1095_vm2, %v3141_v31, 0.0 }
 0x585   : > { %1834 = vadd.xlane.f32.xlu0 %v1833_v12 }
 0x587   : > { %v3143_v9 = vpop.eup %3142 }
 0x588   : > { %v1836_v50 = vsel %vm1095_vm2, %v3143_v9, 0.0  ;;  %v3145_v37 = vpop.eup %3144 }
 0x589   : > { %1837 = vadd.xlane.f32.xlu1 %v1836_v50  ;;  %v3147_v45 = vpop.eup %3146  ;;  %v1949_v53 = vmul.f32 0.6931472, %v3145_v37 }
 0x58a   : > { %v3149_v10 = vpop.eup %3148  ;;  %v1947_v63 = vmul.f32 0.6931472, %v3147_v45 }
 0x58b   : > { %v2109_v13 = vsel %vm1095_vm2, %v3149_v10, 0.0  ;;  %v1951_v44 = vsub.f32 %v4119_v35, %v1949_v53 }
 0x58c   : > { %2110 = vadd.xlane.f32.xlu0 %v2109_v13  ;;  %v1950_v4 = vsub.f32 %v4112_v29, %v1947_v63 }
 0x58d   : > { %v3151_v36 = vpop.eup %3150  ;;  %v1953_v59 = vsub.f32 0.0, %v1951_v44 }
 0x58e   : > { %v2112_v7 = vsel %vm1095_vm2, %v3151_v36, 0.0  ;;  %v1952_v39 = vsub.f32 0.0, %v1950_v4 }
 0x58f   : > { %2113 = vadd.xlane.f32.xlu1 %v2112_v7  ;;  %v1955_v57 = vmul.f32 %v4495_v55, %v1953_v59 }
 0x590   : > { %1127 = vadd.xlane.f32.xlu0 %v4207_v15  ;;  %v1954_v35 = vmul.f32 %v4499_v24, %v1952_v39 }
 0x591   : > { %v1957_v29 = vsel %vm1095_vm2, %v1955_v57, 0.0 }
 0x592   : > { %v1956_v15 = vsel %vm1095_vm2, %v1954_v35, 0.0 }
 0x593   : > { %1235 = vadd.xlane.f32.xlu1 %v4395_v23 }
 0x594   : > { %1510 = vadd.xlane.f32.xlu0 %v4424_v48  ;;  %v1958_v48 = vadd.f32 %v1957_v29, %v1956_v15 }
 0x597   : > { %1403 = vadd.xlane.f32.xlu1 %v4251_v3 }
 0x598   : > { %1681 = vadd.xlane.f32.xlu0 %v4285_v54 }
 0x59b   : > { %1790 = vadd.xlane.f32.xlu1 %v4443_v33 }
 0x59f   : > { %1959 = vadd.xlane.f32.xlu1 %v1958_v48 }
 0x5fe   : > { %v1279_v23 = vpop.xlane.xlu0 %1278 }
 0x5ff   : > { %3152 = vlog2.f32 %v1279_v23 }
 0x602   : > { %v1282_v56 = vpop.xlane.xlu1 %1281 }
 0x603   : > { %3154 = vlog2.f32 %v1282_v56 }
 0x606   : > { %v1555_v5 = vpop.xlane.xlu0 %1554 }
 0x607   : > { %3156 = vlog2.f32 %v1555_v5 }
 0x60a   : > { %v1558_v2 = vpop.xlane.xlu1 %1557 }
 0x60b   : > { %3158 = vlog2.f32 %v1558_v2 }
 0x60c   : > { %v3153_v54 = vpop.eup %3152  ;;  %3160 = vlog2.f32 %v4389_v19 }
 0x60d   : > { %v1284_v3 = vmul.f32 0.6931472, %v3153_v54  ;;  %3162 = vlog2.f32 %v4371_v40 }
 0x60e   : > { %v1835_v41 = vpop.xlane.xlu0 %1834 }
 0x60f   : > { %v1287_v33 = vsub.f32 %v4454_v49, %v1284_v3  ;;  %3164 = vlog2.f32 %v1835_v41 }
 0x610   : > { %v3155_v62 = vpop.eup %3154 }
 0x611   : > { %v1286_v28 = vmul.f32 0.6931472, %v3155_v62  ;;  %v1289_v11 = vsub.f32 0.0, %v1287_v33 }
 0x612   : > { %v1838_v30 = vpop.xlane.xlu1 %1837 }
 0x613   : > { %v1288_v26 = vsub.f32 %v4458_v43, %v1286_v28  ;;  %3166 = vlog2.f32 %v1838_v30  ;;  %v1291_v18 = vmul.f32 %v4156_v20, %v1289_v11 }
 0x614   : > { %v3157_v8 = vpop.eup %3156 }
 0x615   : > { %v1560_v60 = vmul.f32 0.6931472, %v3157_v8  ;;  %v1290_v17 = vsub.f32 0.0, %v1288_v26  ;;  %v2111_v19 = vpop.xlane.xlu0 %2110  ;;  %v1293_v21 = vsel %vm1095_vm2, %v1291_v18, 0.0 }
 0x616   : > { %3168 = vlog2.f32 %v2111_v19 }
 0x617   : > { %v1563_v14 = vsub.f32 %v4462_v47, %v1560_v60  ;;  %v1292_v40 = vmul.f32 %v4162_v27, %v1290_v17 }
 0x618   : > { %v3159_v49 = vpop.eup %3158  ;;  %v2114_v31 = vpop.xlane.xlu1 %2113 }
 0x619   : > { %v3161_v42 = vpop.eup %3160  ;;  %v1562_v38 = vmul.f32 0.6931472, %v3159_v49  ;;  %v1294_v34 = vsel %vm1095_vm2, %v1292_v40, 0.0  ;;  %v1128_v43 = vpop.xlane.xlu0 %1127  ;;  %3170 = vlog2.f32 %v2114_v31  ;;  %v1565_v37 = vsub.f32 0.0, %v1563_v14 }
 0x61a   : > { %v1295_v12 = vadd.f32 %v1294_v34, %v1293_v21  ;;  %v3163_v9 = vpop.eup %3162  ;;  %v1129_v20 = vrot.slane %v1128_v43, 4  ;;  %v2056_v45 = vmul.f32 0.6931472, %v3161_v42 }
 0x61b   : > { %v1564_v50 = vsub.f32 %v4466_v22, %v1562_v38  ;;  %v2054_v13 = vmul.f32 0.6931472, %v3163_v9  ;;  %v1567_v4 = vmul.f32 %v4188_v58, %v1565_v37 }
 0x61c   : > { %v3165_v47 = vpop.eup %3164  ;;  %1296 = vadd.xlane.f32.xlu0 %v1295_v12  ;;  %v1130_v10 = vadd.f32 %v1129_v20, %v1128_v43  ;;  %v1236_v63 = vpop.xlane.xlu1 %1235  ;;  %v2058_v59 = vsub.f32 %v4331_v32, %v2056_v45 }
 0x61d   : > { %v1840_v27 = vmul.f32 0.6931472, %v3165_v47  ;;  %v1566_v53 = vsub.f32 0.0, %v1564_v50  ;;  %v1237_v44 = vrot.slane %v1236_v63, 4  ;;  %v2057_v48 = vsub.f32 %v4324_v0, %v2054_v13 }
 0x61e   : > { %v1131_v7 = vrot.slane %v1130_v10, 2  ;;  %v1569_v56 = vsel %vm1095_vm2, %v1567_v4, 0.0  ;;  %v2060_v54 = vsub.f32 0.0, %v2058_v59 }
 0x61f   : > { %v1843_v36 = vsub.f32 %v4469_v25, %v1840_v27  ;;  %v1568_v22 = vmul.f32 %v4209_v16, %v1566_v53  ;;  %v1238_v57 = vadd.f32 %v1237_v44, %v1236_v63  ;;  %v2059_v62 = vsub.f32 0.0, %v2057_v48 }
 0x620   : > { %v3167_v52 = vpop.eup %3166  ;;  %v1132_v35 = vadd.f32 %v1131_v7, %v1130_v10  ;;  %v2062_v30 = vmul.f32 %v4495_v55, %v2060_v54 }
 0x621   : > { %v1842_v39 = vmul.f32 0.6931472, %v3167_v52  ;;  %v1570_v29 = vsel %vm1095_vm2, %v1568_v22, 0.0  ;;  %v1845_v15 = vsub.f32 0.0, %v1843_v36  ;;  %v1239_v25 = vrot.slane %v1238_v57, 2 }
 0x622   : > { %v1571_v58 = vadd.f32 %v1570_v29, %v1569_v56  ;;  %v1133_v2 = vrot.slane %v1132_v35, 1  ;;  %v2061_v19 = vmul.f32 %v4499_v24, %v2059_v62  ;;  %v2064_v14 = vsel %vm1095_vm2, %v2062_v30, 0.0 }
 0x623   : > { %v1844_v23 = vsub.f32 %v4473_v1, %v1842_v39  ;;  %v3169_v5 = vpop.eup %3168  ;;  %v1240_v3 = vadd.f32 %v1239_v25, %v1238_v57  ;;  %v1847_v33 = vmul.f32 %v4243_v61, %v1845_v15 }
 0x624   : > { %v2116_v16 = vmul.f32 0.6931472, %v3169_v5  ;;  %1572 = vadd.xlane.f32.xlu1 %v1571_v58  ;;  %v1134_v41 = vadd.f32 %v1133_v2, %v1132_v35  ;;  %v2063_v49 = vsel %vm1095_vm2, %v2061_v19, 0.0 }
 0x625   : > { %v1846_v32 = vsub.f32 0.0, %v1844_v23  ;;  %v1241_v0 = vrot.slane %v1240_v3, 1  ;;  %v1849_v17 = vsel %vm1095_vm2, %v1847_v33, 0.0  ;;  %v2065_v42 = vadd.f32 %v2064_v14, %v2063_v49 }
 0x626   : > { %v2119_v28 = vsub.f32 %v4477_v51, %v2116_v16  ;;  %v3171_v11 = vpop.eup %3170  ;;  %2822 = vpush %v1134_v41 }
 0x627   : > { %v1848_v1 = vmul.f32 %v4253_v6, %v1846_v32  ;;  %v2118_v26 = vmul.f32 0.6931472, %v3171_v11  ;;  %v1242_v8 = vadd.f32 %v1241_v0, %v1240_v3 }
 0x628   : > { %v2121_v60 = vsub.f32 0.0, %v2119_v28 }
 0x629   : > { %v1850_v18 = vsel %vm1095_vm2, %v1848_v1, 0.0  ;;  %v2120_v61 = vsub.f32 %v4483_v46, %v2118_v26  ;;  %2824 = vpush %v1242_v8 }
 0x62a   : > { %v1851_v51 = vadd.f32 %v1850_v18, %v1849_v17  ;;  %v2123_v40 = vmul.f32 %v4499_v24, %v2121_v60 }
 0x62b   : > { %v2122_v6 = vsub.f32 0.0, %v2120_v61 }
 0x62c   : > { %1852 = vadd.xlane.f32.xlu0 %v1851_v51  ;;  %v2125_v21 = vsel %vm1095_vm2, %v2123_v40, 0.0 }
 0x62d   : > { %v2124_v38 = vmul.f32 %v4495_v55, %v2122_v6 }
 0x62f   : > { %v2126_v46 = vsel %vm1095_vm2, %v2124_v38, 0.0 }
 0x630   : > { %2066 = vadd.xlane.f32.xlu0 %v2065_v42  ;;  %v2127_v34 = vadd.f32 %v2126_v46, %v2125_v21 }
 0x632   : > { %2128 = vadd.xlane.f32.xlu1 %v2127_v34 }
 0x633   : > { %3413 = shalt.err (!%p3410_p4)
}
 0x634   : > { %s3414_s24 = scalar_lea.hbm %s4547_s19, 512  ;;  %s3418_s11 = scalar_lea.hbm %s4803_s15, 1024 }
 0x635   : > { %p3415_p6 = scmp.ne.s32.totalorder %s4547_s19, %s3414_s24  ;;  %p3419_p8 = scmp.lt.s32.totalorder %s4547_s19, %s4803_s15 }
 0x636   : > { %p3420_p2 = scmp.lt.s32.totalorder %s3418_s11, %s3414_s24 }
 0x637   : > { %p3416_p5 = pnand %p3415_p6, %p3765_p12 }
 0x638   : > { %p3421_p13 = por %p3420_p2, %p3419_p8 }
 0x639   : > { %p3417_p7 = pneg %p3416_p5 }
 0x63b   : > { %p3422_p10 = pnand %p3421_p13, %p3417_p7 }
 0x63d   : > { %3425 = shalt.err (!%p3422_p10)
}
 0x63e   : > { %s4754_s25 = smov 64   ;;  %s4756_s12 = smov 4   ;;  %v1404_v55 = vpop.xlane.xlu1 %1403  ;;  %v1511_v24 = vpop.xlane.xlu0 %1510 }
 0x63f   : > { %2867 = dma.vmem_to_hbm [thread:$0]  (%p3765_p12), %s4550_s27, 512, %s4547_s19, %s4753_s4, %s4754_s25, %s4754_s25, %s4756_s12   ;;  %v1405_v43 = vrot.slane %v1404_v55, 4  ;;  %v1512_v31 = vrot.slane %v1511_v24, 4 }
 0x640   : > { %s4804_s2 = sld [smem:[#allocation47_spill]] }
 0x641   : > { %v1406_v9 = vadd.f32 %v1405_v43, %v1404_v55  ;;  %v1513_v50 = vadd.f32 %v1512_v31, %v1511_v24 }
 0x642   : > { %v1682_v12 = vpop.xlane.xlu0 %1681  ;;  %v1791_v37 = vpop.xlane.xlu1 %1790 }
 0x643   : > { %v1407_v20 = vrot.slane %v1406_v9, 2  ;;  %v1514_v45 = vrot.slane %v1513_v50, 2  ;;  %v1683_v10 = vrot.slane %v1682_v12, 4  ;;  %v1792_v53 = vrot.slane %v1791_v37, 4 }
 0x645   : > { %v1408_v63 = vadd.f32 %v1407_v20, %v1406_v9  ;;  %v1515_v7 = vadd.f32 %v1514_v45, %v1513_v50  ;;  %v1684_v44 = vadd.f32 %v1683_v10, %v1682_v12  ;;  %v1793_v52 = vadd.f32 %v1792_v53, %v1791_v37 }
 0x646   : > { %v1960_v4 = vpop.xlane.xlu1 %1959  ;;  %s4584_s4 = scalar_lea.hbm %s4804_s2, %s4541_s29  ;;  %v2141_v50 = vlaneseq }
 0x647   : > { %v1409_v59 = vrot.slane %v1408_v63, 1  ;;  %v1961_v39 = vrot.slane %v1960_v4, 4  ;;  %v1516_v35 = vrot.slane %v1515_v7, 1  ;;  %v1685_v29 = vrot.slane %v1684_v44, 2 }
 0x648   : > { %v1794_v48 = vrot.slane %v1793_v52, 2  ;;  %v4603_v20 = vshrl.u32 %v2141_v50, 7 }
 0x649   : > { %v1410_v56 = vadd.f32 %v1409_v59, %v1408_v63  ;;  %v1962_v5 = vadd.f32 %v1961_v39, %v1960_v4  ;;  %v1517_v2 = vadd.f32 %v1516_v35, %v1515_v7  ;;  %v1686_v54 = vadd.f32 %v1685_v29, %v1684_v44 }
 0x64a   : > { %v1795_v3 = vadd.f32 %v1794_v48, %v1793_v52 }
 0x64b   : > { %v1963_v32 = vrot.slane %v1962_v5, 2  ;;  %v1687_v28 = vrot.slane %v1686_v54, 1 }
 0x64c   : > { %v1796_v11 = vrot.slane %v1795_v3, 1 }
 0x64d   : > { %v1964_v8 = vadd.f32 %v1963_v32, %v1962_v5  ;;  %v1688_v18 = vadd.f32 %v1687_v28, %v1686_v54 }
 0x64e   : > { %v1797_v19 = vadd.f32 %v1796_v11, %v1795_v3 }
 0x64f   : > { %v1965_v40 = vrot.slane %v1964_v8, 1 }
 0x651   : > { %v1966_v55 = vadd.f32 %v1965_v40, %v1964_v8 }
 0x657   : > { %s2823_s13 = spop %2822 }
 0x65a   : > { %s2825_s26 = spop %2824 }
 0x6a5   : > { %v1297_v47 = vpop.xlane.xlu0 %1296 }
 0x6a6   : > { %v1298_v27 = vrot.slane %v1297_v47, 4 }
 0x6a8   : > { %v1299_v13 = vadd.f32 %v1298_v27, %v1297_v47 }
 0x6aa   : > { %v1300_v36 = vrot.slane %v1299_v13, 2 }
 0x6ac   : > { %v1301_v22 = vadd.f32 %v1300_v36, %v1299_v13 }
 0x6ad   : > { %v1573_v15 = vpop.xlane.xlu1 %1572 }
 0x6ae   : > { %v1302_v57 = vrot.slane %v1301_v22, 1  ;;  %v1574_v23 = vrot.slane %v1573_v15, 4 }
 0x6b0   : > { %v1303_v25 = vadd.f32 %v1302_v57, %v1301_v22  ;;  %v1575_v58 = vadd.f32 %v1574_v23, %v1573_v15 }
 0x6b2   : > { %2826 = vpush %v1303_v25  ;;  %v1576_v16 = vrot.slane %v1575_v58, 2 }
 0x6b3   : > { %2828 = vpush %v1410_v56 }
 0x6b4   : > { %2830 = vpush %v1517_v2  ;;  %v1577_v33 = vadd.f32 %v1576_v16, %v1575_v58 }
 0x6b5   : > { %v1853_v41 = vpop.xlane.xlu0 %1852 }
 0x6b6   : > { %v1854_v62 = vrot.slane %v1853_v41, 4  ;;  %v1578_v0 = vrot.slane %v1577_v33, 1 }
 0x6b8   : > { %v1855_v1 = vadd.f32 %v1854_v62, %v1853_v41  ;;  %v1579_v26 = vadd.f32 %v1578_v0, %v1577_v33 }
 0x6b9   : > { %v2067_v30 = vpop.xlane.xlu0 %2066 }
 0x6ba   : > { %v1856_v60 = vrot.slane %v1855_v1, 2  ;;  %v2068_v17 = vrot.slane %v2067_v30, 4  ;;  %2832 = vpush %v1579_v26 }
 0x6bb   : > { %2834 = vpush %v1688_v18  ;;  %v2129_v51 = vpop.xlane.xlu1 %2128 }
 0x6bc   : > { %v2069_v61 = vadd.f32 %v2068_v17, %v2067_v30  ;;  %v1857_v14 = vadd.f32 %v1856_v60, %v1855_v1  ;;  %2836 = vpush %v1797_v19  ;;  %v2130_v6 = vrot.slane %v2129_v51, 4 }
 0x6be   : > { %v2070_v49 = vrot.slane %v2069_v61, 2  ;;  %v1858_v42 = vrot.slane %v1857_v14, 1  ;;  %v2131_v38 = vadd.f32 %v2130_v6, %v2129_v51 }
 0x6c0   : > { %v1859_v21 = vadd.f32 %v1858_v42, %v1857_v14  ;;  %v2071_v46 = vadd.f32 %v2070_v49, %v2069_v61  ;;  %v2132_v34 = vrot.slane %v2131_v38, 2 }
 0x6c2   : > { %2838 = vpush %v1859_v21  ;;  %v2072_v24 = vrot.slane %v2071_v46, 1  ;;  %v2133_v43 = vadd.f32 %v2132_v34, %v2131_v38 }
 0x6c3   : > { %2840 = vpush %v1966_v55 }
 0x6c4   : > { %v2073_v31 = vadd.f32 %v2072_v24, %v2071_v46  ;;  %v2134_v12 = vrot.slane %v2133_v43, 1 }
 0x6c6   : > { %2842 = vpush %v2073_v31  ;;  %v2135_v9 = vadd.f32 %v2134_v12, %v2133_v43 }
 0x6c8   : > { %2844 = vpush %v2135_v9 }
 0x6e3   : > { %s2827_s14 = spop %2826 }
 0x6e4   : > { %s2829_s19 = spop %2828 }
 0x6e5   : > { %s2831_s27 = spop %2830  ;;  %s1416_s18 = sadd.f32 %s2829_s19, %s2823_s13 }
 0x6e6   : > { %s1523_s0 = sadd.f32 %s2831_s27, %s2825_s26 }
 0x6e7   : > { %s4805_s27 = sld [smem:[#allocation45_spill]] }
 0x6eb   : > { %s2833_s22 = spop %2832 }
 0x6ec   : > { %s2835_s21 = spop %2834  ;;  %s1581_s3 = sadd.f32 %s2833_s22, %s2827_s14 }
 0x6ed   : > { %s2837_s24 = spop %2836  ;;  %s4578_s9 = sadd.f32 %s2835_s21, %s1416_s18 }
 0x6ee   : > { %s4586_s25 = sadd.f32 %s2837_s24, %s1523_s0  ;;  %s4806_s22 = smov %s4805_s27 }
 0x6ef   : > { %s4598_s21 = scalar_lea.hbm %s4805_s27, %s4541_s29  ;;  %s2191_s18 = sshll.u32 %s4008_s30, 4  ;;  %s4605_s18 = int_to_ptr.vmem [resolvable:$true] %s2191_s18 }
 0x6f0   : > { %s2227_s0 = sshll.u32 %s4367_s16, 4  ;;  %s2159_s24 = scalar_lea.sflag [#allocation6], %s3904_s1  ;;  %s4645_s0 = int_to_ptr.vmem [resolvable:$true] %s2227_s0 }
 0x6f1   : > { %s3579_s29 = smov [#allocation17]  }
 0x6f2   : > { %s3430_s30 = sshll.u32 %s3579_s29, 4  ;;  %s3431_s30 = int_to_ptr.vmem [resolvable:$false] %s3430_s30 }
 0x6f3   : > { %s2839_s12 = spop %2838  ;;  %s3432_s23 = scalar_lea.vmem %s3431_s30, 1024 }
 0x6f4   : > { %s4588_s5 = sadd.f32 %s2839_s12, %s1581_s3  ;;  %s4590_s13 = spop %2840 }
 0x6f5   : > { %s3426_s3 = scalar_lea.vmem %s4605_s18, 512  ;;  %p3433_p1 = scmp.lt.s32.totalorder %s4605_s18, %s3431_s30 }
 0x6f6   : > { %p3427_p9 = scmp.ne.s32.totalorder %s4605_s18, %s3426_s3  ;;  %p3434_p0 = scmp.lt.s32.totalorder %s3432_s23, %s3426_s3 }
 0x6f7   : > { %s4601_s11 = spop %2842 }
 0x6f8   : > { %s2079_s12 = sadd.f32 %s4601_s11, %s4586_s25  ;;  %p3428_p11 = pnand %p3427_p9, %p3765_p12 }
 0x6f9   : > { %p3435_p4 = por %p3434_p0, %p3433_p1 }
 0x6fa   : > { %p3429_p3 = pneg %p3428_p11 }
 0x6fc   : > { %p3436_p6 = pnand %p3435_p4, %p3429_p3 }
 0x6fe   : > { %3439 = shalt.err (!%p3436_p6)
}
 0x6ff   : > { %s3440_s14 = scalar_lea.hbm %s4598_s21, 512  ;;  %s3444_s27 = scalar_lea.hbm %s4806_s22, 1024 }
 0x700   : > { %p3441_p5 = scmp.ne.s32.totalorder %s4598_s21, %s3440_s14  ;;  %p3445_p2 = scmp.lt.s32.totalorder %s4598_s21, %s4806_s22 }
 0x701   : > { %p3446_p13 = scmp.lt.s32.totalorder %s3444_s27, %s3440_s14 }
 0x702   : > { %p3442_p7 = pnand %p3441_p5, %p3765_p12 }
 0x703   : > { %p3447_p10 = por %p3446_p13, %p3445_p2 }
 0x704   : > { %p3443_p8 = pneg %p3442_p7 }
 0x706   : > { %p3448_p9 = pnand %p3447_p10, %p3443_p8 }
 0x708   : > { %3451 = shalt.err (!%p3448_p9)
}
 0x709   : > { %s4807_s3 = smov 4   ;;  %s4808_s30 = smov 64   ;;  %v2139_v37 = vstv %s2079_s12  ;;  %vm4637_vm4 = vcmp.lt.s32.totalorder %v2141_v50, 1  ;;  %vm4652_vm5 = vcmp.lt.s32.totalorder %v2141_v50, 2  ;;  %v2151_v10 = vsub.s32 0, %v4603_v20 }
 0x70a   : > { %2866 = dma.vmem_to_hbm [thread:$0]  (%p3765_p12), %s4605_s18, 512, %s4598_s21, %s2159_s24, %s4808_s30, %s4808_s30, %s4807_s3  }
 0x70b   : > { %s4641_s26 = spop %2844  ;;  %s4811_s23 = sadd.f32 %s4590_s13, %s4578_s9 }
 0x70c   : > { %s2137_s14 = sadd.f32 %s4641_s26, %s4588_s5  ;;  %s3452_s25 = scalar_lea.vmem %s4645_s0, 512 }
 0x70d   : > { %v2138_v45 = vstv %s4811_s23  ;;  %p3453_p11 = scmp.ne.s32.totalorder %s4645_s0, %s3452_s25  ;;  %s3580_s16 = smov [#allocation20]  }
 0x70e   : > { %s3456_s21 = sshll.u32 %s3580_s16, 4  ;;  %s3457_s21 = int_to_ptr.vmem [resolvable:$false] %s3456_s21 }
 0x70f   : > { %p3454_p3 = pnand %p3453_p11, %p3765_p12  ;;  %s3458_s9 = scalar_lea.vmem %s3457_s21, 1024 }
 0x710   : > { %p3459_p0 = scmp.lt.s32.totalorder %s4645_s0, %s3457_s21  ;;  %p3460_p4 = scmp.lt.s32.totalorder %s3458_s9, %s3452_s25 }
 0x711   : > { %p3455_p1 = pneg %p3454_p3 }
 0x712   : > { %p3461_p6 = por %p3460_p4, %p3459_p0 }
 0x714   : > { %p3462_p5 = pnand %p3461_p6, %p3455_p1 }
 0x716   : > { %3465 = shalt.err (!%p3462_p5)
}
 0x717   : > { %s3466_s13 = scalar_lea.hbm %s4584_s4, 512  ;;  %s3470_s12 = scalar_lea.hbm %s4804_s2, 1024 }
 0x718   : > { %p3467_p7 = scmp.ne.s32.totalorder %s4584_s4, %s3466_s13  ;;  %p3471_p13 = scmp.lt.s32.totalorder %s4584_s4, %s4804_s2 }
 0x719   : > { %p3472_p10 = scmp.lt.s32.totalorder %s3470_s12, %s3466_s13 }
 0x71a   : > { %p3468_p8 = pnand %p3467_p7, %p3765_p12 }
 0x71b   : > { %p3473_p9 = por %p3472_p10, %p3471_p13 }
 0x71c   : > { %p3469_p2 = pneg %p3468_p8 }
 0x71e   : > { %p3474_p11 = pnand %p3473_p9, %p3469_p2 }
 0x720   : > { %3477 = shalt.err (!%p3474_p11)
}
 0x721   : > { %s4814_s19 = scalar_lea.sflag [#allocation19], %s3901_s17  ;;  %v2145_v53 = vsel %vm4637_vm4, %v2138_v45, %v2139_v37  ;;  %v2140_v13 = vstv %s2137_s14  ;;  %p700_p3 = scmp.lt.s32.totalorder %s4801_s20, 1  ;;  %vm2156_vm6 = vcmask 2048  }
 0x722   : > { %2868 = dma.vmem_to_hbm [thread:$0]  (%p3765_p12), %s4645_s0, 512, %s4584_s4, %s4814_s19, %s4808_s30, %s4808_s30, %s4807_s3   ;;  %v2148_v63 = vsel %vm4652_vm5, %v2145_v53, %v2140_v13 }
 0x723   : > { %v2152_v36 = vrot.slane %v2148_v63, %v2151_v10  ;;  %s4829_s20 = smov (!%p700_p3, %s4801_s20), 1  ;;  %s4815_s29 = sld [smem:[#allocation48_spill]] }
 0x724   : > { %s2585_s17 = sshll.u32 %s4829_s20, 2 }
 0x725   : > { %2154 = vbcast.lane.b32.xlu0 %v2152_v36, 256 }
 0x729   : > { %s706_s23 = scalar_lea.vmem %s4815_s29, %s2585_s17 }
 0x797   : > { %v2155_v7 = vpop.permute.xlu0 %2154 }
 0x798   : > { %2157 = vst.msk [vmem:[%s706_s23] sm:$0x7] %vm2156_vm6, %v2155_v7 }
 0x799 PF: > { %s4816_s4 = sld [smem:[#allocation30_spill]]  ;;  %p4819_p1 = scmp.ge.s32.totalorder %s3558_s28, 2 }
 0x79a   : > { %s4817_s0 = sld [smem:[#allocation39_spill]] }
 0x79f   : > { %s2245_s5 = sand.u32 1, %s4816_s4  }
 0x7a0   : > { %p4818_p12 = scmp.ne.s32.totalorder %s4817_s0, 0  ;;  %s2246_s3 = scalar_lea.sflag [#allocation6], %s2245_s5 }
 0x7a2   : > { %p2899_p0 = pnand %p4819_p1, %p4818_p12 }
 0x7a4   : > { %p2900_p4 = pneg %p2899_p0 }
 0x7a6   : > { %3529 = dma.done.wait (%p2900_p4), %s2246_s3, 512  }
 0x7a7   : > { %3531 = vsyncadd (%p2900_p4), %s2246_s3, 4294966784  ;;  %s4820_s20 = sadd.s32 4294967294, %s3558_s28  }
 0x7a8   : > { %s2254_s30 = sand.u32 1, %s4820_s20  }
 0x7a9   : > { %s2255_s26 = scalar_lea.sflag [#allocation19], %s2254_s30 }
 0x7aa   : > { %3533 = dma.done.wait (%p2900_p4), %s2255_s26, 1024  }
 0x7ab   : > { %3535 = vsyncadd (%p2900_p4), %s2255_s26, 4294966272  ;;  %s43_s28 = sadd.s32 1, %s3558_s28   ;;  %s4821_s24 = sld [smem:[#allocation31_spill]] }
 0x7ac   : > { %p40_p6 = scmp.ge.s32.totalorder %s43_s28, 4   ;;  %s4822_s25 = sld [smem:[#allocation32_spill]] }
 0x7ad   : > { %s4823_s26 = sld [smem:[#allocation36_spill]] }
 0x7ae   : > { %s4824_s0 = sld [smem:[#allocation34_spill]]  ;;  %42 = sbr.rel (!%p40_p6) target bundleno = 27 (0x1b), region = 223 }
 0x7af   : > { %s4825_s27 = sld [smem:[#allocation35_spill]] }
 0x7b3   :  { %2279 = vsyncpa [#allocation5], 1 }
 0x7b4   :  { %2281 = vsyncpa [#allocation5 + $0x1], 1 }
 0x7b5   :  { %2282 = vsyncpa [#allocation8], 1 }
 0x7b6   :  { %2283 = vsyncpa [#allocation13], 1 }
 0x7b7   :  { %2285 = vsyncpa [#allocation13 + $0x1], 1 }
 0x7b8   :  { %2286 = vsyncpa [#allocation16], 1 }
 0x7b9   :  { %2288 = vsyncpa [#allocation16 + $0x1], 1 }
 0x7ba   :  { %2289 = vsyncpa [#allocation6], 1 }
 0x7bb   :  { %2291 = vsyncpa [#allocation6 + $0x1], 1 }
 0x7bc   :  { %2292 = vsyncpa [#allocation19], 1 }
 0x7bd   :  { %2294 = vsyncpa [#allocation19 + $0x1], 1 }

</bundles_post_ra>
